<compile_context>
chip_gen: v7x
topology: tpu7x:2x2x1
jax: 0.10.0
libtpu: 0.0.40
codegen_flags: <defaults>
</compile_context>

<pallas_src>
import functools

import jax
import jax.numpy as jnp
from jax.experimental import pallas as pl
from jax.experimental.pallas import tpu as pltpu


def _conv_bn_silu_kernel(a_ref, w_ref, b_ref, o_ref, *, k, wp, tm, c1):
    # a_ref: (1, tm+halo, c1)  bf16  flat padded pixel rows [i*tm, i*tm+tm+halo)
    # w_ref: (k, k*c1, tn)     bf16  BN-scale-folded weights, rows ordered (kw, c1)
    # b_ref: (1, tn)           f32   BN bias (beta - mean*scale)
    # o_ref: (tm, tn)          bf16  output tile (throwaway padded rows sliced off outside)
    a = a_ref[0]                                  # (tm+halo, c1) bf16
    tn = o_ref.shape[-1]
    acc = jnp.zeros((tm, tn), jnp.float32)

    fuse_kw = (k > 1) and (c1 < 256)              # lane-fuse kw taps for small C1 (MXU fill)
    for kh in range(k):                           # static unroll, k in {1,3,5,...}
        base = kh * wp
        if fuse_kw:
            lhs = jnp.concatenate(
                [a[base + kw: base + kw + tm, :] for kw in range(k)], axis=1)
            acc = acc + jnp.dot(lhs, w_ref[kh], preferred_element_type=jnp.float32)
        else:
            w_kh = w_ref[kh]                      # (k*c1, tn)
            for kw in range(k):
                acc = acc + jnp.dot(a[base + kw: base + kw + tm, :],
                                    w_kh[kw * c1:(kw + 1) * c1, :],
                                    preferred_element_type=jnp.float32)

    y = acc + b_ref[...]                          # BN affine (scale folded into weights)
    # SiLU: y * sigmoid(y). Clamp exp input so approx reciprocal never sees inf.
    z = jnp.exp(jnp.minimum(-y, 80.0))
    o_ref[...] = (y * pl.reciprocal(1.0 + z, approx=True)).astype(o_ref.dtype)


def _round_up(x, m):
    return ((x + m - 1) // m) * m


def _cdiv(a, b):
    return -(-a // b)


_TARGET_ROWS = 1024  # ~1024-row tiles amortize per-step overhead; per-step VMEM stays small


@functools.partial(jax.jit, static_argnames=("k", "s"))
def conv_bn_silu(x_nchw, weight, gamma, beta, run_mean, run_var, k=3, s=1, eps=1e-5):
    """YOLO Conv block forward. x_nchw: (N, C1, H, W) f32; weight: (C2, C1, k, k)."""
    # TODO(synk): stride > 1 and groups > 1 variants of nn.Conv2d are not implemented.
    assert s == 1, "only stride 1 supported"
    assert k % 2 == 1, "only odd kernel sizes supported"
    p = k // 2
    n, c1, h, w_in = x_nchw.shape
    c2 = weight.shape[0]
    hp_, wp = h + 2 * p, w_in + 2 * p

    # NCHW -> NHWC bf16, pad spatially, flatten pixel rows.
    # TODO(synk): in a full YOLO pipeline keep activations NHWC bf16 between layers to
    # drop these boundary transposes (pure layout HBM traffic).
    x = jnp.transpose(x_nchw.astype(jnp.bfloat16), (0, 2, 3, 1))
    x = jnp.pad(x, ((0, 0), (p, p), (p, p), (0, 0)))            # (N, H+2p, Wp, C1)
    m_total = n * hp_ * wp
    x_flat = x.reshape(m_total, c1)                             # (M, C1) bf16

    # Output channel tiling: lane-dense, MXU-friendly (tn=256 when C2 >= 256).
    c2p = _round_up(c2, 128)
    if c2p >= 256:
        c2p = _round_up(c2p, 256)
        tn = 256
    else:
        tn = 128
    n_j = c2p // tn

    # Row tiling. halo = max flat-row shift of any tap (kh*wp + kw).
    halo = (k - 1) * wp + (k - 1)
    tm_min = _round_up(max(halo, 16), 16)
    tm = max(tm_min, _round_up(min(_TARGET_ROWS, m_total), 16))
    n_i = _cdiv(m_total, tm)
    # v7x megacore: expose >= 2 parallel blocks when the whole problem fits one tile.
    if n_i * n_j < 2 and m_total >= 2 * tm_min:
        tm = max(tm_min, _round_up(_cdiv(m_total, 2), 16))
        n_i = _cdiv(m_total, tm)

    # Halo'd row tiles: tile i holds flat rows [i*tm, i*tm + tm + halo). Valid outputs
    # only ever read real in-image rows; padded-column / bottom-pad outputs are garbage
    # and get sliced off below.
    x_pad = jnp.pad(x_flat, ((0, (n_i + 1) * tm - m_total), (0, 0)))
    main = x_pad[: n_i * tm].reshape(n_i, tm, c1)
    if halo > 0:
        nxt = x_pad[tm: (n_i + 1) * tm].reshape(n_i, tm, c1)[:, :halo]
        a = jnp.concatenate([main, nxt], axis=1)                # (n_i, tm+halo, C1)
    else:
        a = main

    # Fold BN (eval semantics) into weights (scale) and a per-channel bias.
    scale = (gamma / jnp.sqrt(run_var + eps)).astype(jnp.float32)           # (C2,)
    bias = (beta - run_mean * scale).astype(jnp.float32)                    # (C2,)
    w_f = jnp.transpose(weight.astype(jnp.float32), (2, 3, 1, 0)) * scale   # (kh,kw,C1,C2)
    w_f = w_f.reshape(k, k * c1, c2)
    w_f = jnp.pad(w_f, ((0, 0), (0, 0), (0, c2p - c2))).astype(jnp.bfloat16)
    bias_p = jnp.pad(bias, (0, c2p - c2)).reshape(1, c2p)

    # Grid-axis order: operand indexed only by the OUTER axis is DMA'd once per outer
    # value; the inner-indexed operand is re-fetched n_outer*n_inner times. Pick the
    # order that minimizes total HBM traffic.
    a_bytes = a.size * 2
    w_bytes = w_f.size * 2
    i_outer = (a_bytes + w_bytes * n_i) <= (w_bytes + a_bytes * n_j)
    if i_outer:
        grid = (n_i, n_j)
        a_map = lambda i, j: (i, 0, 0)
        w_map = lambda i, j: (0, 0, j)
        b_map = lambda i, j: (0, j)
        o_map = lambda i, j: (i, j)
    else:
        grid = (n_j, n_i)
        a_map = lambda j, i: (i, 0, 0)
        w_map = lambda j, i: (0, 0, j)
        b_map = lambda j, i: (0, j)
        o_map = lambda j, i: (i, j)

    # Scoped VMEM: double-buffered blocks + in-kernel temporaries; keep above v5e's
    # 16 MiB default, below v7x's 64 MiB physical.
    blk = (tm + halo) * c1 * 2 + k * k * c1 * tn * 2 + tn * 4 + tm * tn * 2
    tmp = (tm + halo) * c1 * 2 + tm * max(k * c1, tn) * 2 + tm * tn * 4
    vmem_limit = int(min(48 * 2 ** 20, max(32 * 2 ** 20, 2 * blk + tmp)))

    out = pl.pallas_call(
        functools.partial(_conv_bn_silu_kernel, k=k, wp=wp, tm=tm, c1=c1),
        out_shape=jax.ShapeDtypeStruct((n_i * tm, c2p), jnp.bfloat16),
        grid_spec=pltpu.PrefetchScalarGridSpec(
            num_scalar_prefetch=0,
            grid=grid,
            in_specs=[
                pl.BlockSpec((1, tm + halo, c1), a_map),
                pl.BlockSpec((k, k * c1, tn), w_map),
                pl.BlockSpec((1, tn), b_map),
            ],
            out_specs=pl.BlockSpec((tm, tn), o_map),
        ),
        compiler_params=pltpu.CompilerParams(
            dimension_semantics=("parallel", "parallel"),
            vmem_limit_bytes=vmem_limit),
    )(a, w_f, bias_p)

    # Strip padded rows / padded columns / padded channels, back to NCHW f32.
    out = out[:m_total].reshape(n, hp_, wp, c2p)[:, :h, :w_in, :c2]
    return jnp.transpose(out, (0, 3, 1, 2)).astype(x_nchw.dtype)


if __name__ == "__main__":
    # small deterministic setup: Conv(c1=4, c2=8, k=3, s=1)
    N, C1, H, W = 2, 4, 16, 16
    C2, K, S = 8, 3, 1

    key = jax.random.PRNGKey(0)
    kx, kw_, kg, kb, km, kv = jax.random.split(key, 6)
    x = jax.random.normal(kx, (N, C1, H, W), dtype=jnp.float32)
    weight = 0.1 * jax.random.normal(kw_, (C2, C1, K, K), dtype=jnp.float32)
    gamma = 1.0 + 0.1 * jax.random.normal(kg, (C2,), dtype=jnp.float32)
    beta = 0.1 * jax.random.normal(kb, (C2,), dtype=jnp.float32)
    run_mean = 0.1 * jax.random.normal(km, (C2,), dtype=jnp.float32)
    run_var = jnp.abs(1.0 + 0.1 * jax.random.normal(kv, (C2,), dtype=jnp.float32))

    y = conv_bn_silu(x, weight, gamma, beta, run_mean, run_var, k=K, s=S)
    y = jax.block_until_ready(y)
    assert y.shape == (N, C2, H, W)

    # pure-JAX reference (BN eval mode, matching PyTorch semantics)
    ref = jax.lax.conv_general_dilated(
        x, weight, window_strides=(S, S),
        padding=((K // 2,) * 2, (K // 2,) * 2),
        dimension_numbers=("NCHW", "OIHW", "NCHW"))
    sc = (gamma / jnp.sqrt(run_var + 1e-5)).reshape(1, C2, 1, 1)
    bs = (beta - run_mean * gamma / jnp.sqrt(run_var + 1e-5)).reshape(1, C2, 1, 1)
    ref = ref * sc + bs
    ref = ref * jax.nn.sigmoid(ref)
    # bf16 operands + bf16 kernel output (f32 accumulation) -> loosened tolerance
    assert jnp.allclose(y, ref, rtol=2e-2, atol=2e-2), "mismatch vs reference"

    print("KERNEL_OK")
</pallas_src>

<mosaic_0001>
module attributes {stable_mosaic.version = 11 : i64} {
  func.func @_conv_bn_silu_kernel(%arg0: i32, %arg1: i32, %arg2: memref<1x374x4xbf16, #tpu.memory_space<vmem>>, %arg3: memref<3x12x128xbf16, #tpu.memory_space<vmem>>, %arg4: memref<1x128xf32, #tpu.memory_space<vmem>>, %arg5: memref<336x128xbf16, #tpu.memory_space<vmem>>) attributes {dimension_semantics = [#tpu.dimension_semantics<parallel>, #tpu.dimension_semantics<parallel>], iteration_bounds = array<i64: 1, 2>, scalar_prefetch = 0 : i64, scratch_operands = 0 : i64, tpu.core_type = #tpu.core_type<tc>, window_params = [{transform_indices = @transform_0, window_bounds = array<i64: 1, 374, 4>}, {transform_indices = @transform_1, window_bounds = array<i64: 3, 12, 128>}, {transform_indices = @transform_2, window_bounds = array<i64: 1, 128>}, {transform_indices = @transform_3, window_bounds = array<i64: 336, 128>}]} {
    %c0 = arith.constant 0 : index
    %c0_0 = arith.constant 0 : index
    %c0_1 = arith.constant 0 : index
    %0 = vector.load %arg2[%c0, %c0_0, %c0_1] : memref<1x374x4xbf16, #tpu.memory_space<vmem>>, vector<1x374x4xbf16>
    %1 = vector.shape_cast %0 : vector<1x374x4xbf16> to vector<374x4xbf16>
    %cst = arith.constant 0.000000e+00 : f32
    %2 = vector.broadcast %cst : f32 to vector<336x128xf32>
    %3 = vector.extract_strided_slice %1 {offsets = [0, 0], sizes = [336, 4], strides = [1, 1]} : vector<374x4xbf16> to vector<336x4xbf16>
    %4 = vector.extract_strided_slice %1 {offsets = [1, 0], sizes = [336, 4], strides = [1, 1]} : vector<374x4xbf16> to vector<336x4xbf16>
    %5 = vector.extract_strided_slice %1 {offsets = [2, 0], sizes = [336, 4], strides = [1, 1]} : vector<374x4xbf16> to vector<336x4xbf16>
    %6 = tpu.concatenate %3, %4, %5 in 1 : vector<336x4xbf16>, vector<336x4xbf16>, vector<336x4xbf16> -> vector<336x12xbf16>
    %c0_2 = arith.constant 0 : index
    %c0_3 = arith.constant 0 : index
    %c0_4 = arith.constant 0 : index
    %7 = vector.load %arg3[%c0_2, %c0_3, %c0_4] : memref<3x12x128xbf16, #tpu.memory_space<vmem>>, vector<1x12x128xbf16>
    %8 = vector.shape_cast %7 : vector<1x12x128xbf16> to vector<12x128xbf16>
    %cst_5 = arith.constant dense<0.000000e+00> : vector<336x128xf32>
    %9 = tpu.matmul %6, %8, %cst_5 {dimension_numbers = #tpu.dot_dimension_numbers<[1], [0], [0], [1], [0, 0, 1, 1], [], []>} : vector<336x12xbf16>, vector<12x128xbf16>, vector<336x128xf32> -> vector<336x128xf32>
    %10 = arith.addf %2, %9 : vector<336x128xf32>
    %11 = vector.extract_strided_slice %1 {offsets = [18, 0], sizes = [336, 4], strides = [1, 1]} : vector<374x4xbf16> to vector<336x4xbf16>
    %12 = vector.extract_strided_slice %1 {offsets = [19, 0], sizes = [336, 4], strides = [1, 1]} : vector<374x4xbf16> to vector<336x4xbf16>
    %13 = vector.extract_strided_slice %1 {offsets = [20, 0], sizes = [336, 4], strides = [1, 1]} : vector<374x4xbf16> to vector<336x4xbf16>
    %14 = tpu.concatenate %11, %12, %13 in 1 : vector<336x4xbf16>, vector<336x4xbf16>, vector<336x4xbf16> -> vector<336x12xbf16>
    %c1 = arith.constant 1 : index
    %c0_6 = arith.constant 0 : index
    %c0_7 = arith.constant 0 : index
    %15 = vector.load %arg3[%c1, %c0_6, %c0_7] : memref<3x12x128xbf16, #tpu.memory_space<vmem>>, vector<1x12x128xbf16>
    %16 = vector.shape_cast %15 : vector<1x12x128xbf16> to vector<12x128xbf16>
    %cst_8 = arith.constant dense<0.000000e+00> : vector<336x128xf32>
    %17 = tpu.matmul %14, %16, %cst_8 {dimension_numbers = #tpu.dot_dimension_numbers<[1], [0], [0], [1], [0, 0, 1, 1], [], []>} : vector<336x12xbf16>, vector<12x128xbf16>, vector<336x128xf32> -> vector<336x128xf32>
    %18 = arith.addf %10, %17 : vector<336x128xf32>
    %19 = vector.extract_strided_slice %1 {offsets = [36, 0], sizes = [336, 4], strides = [1, 1]} : vector<374x4xbf16> to vector<336x4xbf16>
    %20 = vector.extract_strided_slice %1 {offsets = [37, 0], sizes = [336, 4], strides = [1, 1]} : vector<374x4xbf16> to vector<336x4xbf16>
    %21 = vector.extract_strided_slice %1 {offsets = [38, 0], sizes = [336, 4], strides = [1, 1]} : vector<374x4xbf16> to vector<336x4xbf16>
    %22 = tpu.concatenate %19, %20, %21 in 1 : vector<336x4xbf16>, vector<336x4xbf16>, vector<336x4xbf16> -> vector<336x12xbf16>
    %c2 = arith.constant 2 : index
    %c0_9 = arith.constant 0 : index
    %c0_10 = arith.constant 0 : index
    %23 = vector.load %arg3[%c2, %c0_9, %c0_10] : memref<3x12x128xbf16, #tpu.memory_space<vmem>>, vector<1x12x128xbf16>
    %24 = vector.shape_cast %23 : vector<1x12x128xbf16> to vector<12x128xbf16>
    %cst_11 = arith.constant dense<0.000000e+00> : vector<336x128xf32>
    %25 = tpu.matmul %22, %24, %cst_11 {dimension_numbers = #tpu.dot_dimension_numbers<[1], [0], [0], [1], [0, 0, 1, 1], [], []>} : vector<336x12xbf16>, vector<12x128xbf16>, vector<336x128xf32> -> vector<336x128xf32>
    %26 = arith.addf %18, %25 : vector<336x128xf32>
    %c0_12 = arith.constant 0 : index
    %c0_13 = arith.constant 0 : index
    %27 = vector.load %arg4[%c0_12, %c0_13] : memref<1x128xf32, #tpu.memory_space<vmem>>, vector<1x128xf32>
    %28 = vector.broadcast %27 : vector<1x128xf32> to vector<336x128xf32>
    %29 = arith.addf %26, %28 : vector<336x128xf32>
    %cst_14 = arith.constant 0.000000e+00 : f32
    %30 = vector.broadcast %cst_14 : f32 to vector<336x128xf32>
    %31 = arith.subf %30, %29 : vector<336x128xf32>
    %cst_15 = arith.constant 8.000000e+01 : f32
    %32 = vector.broadcast %cst_15 : f32 to vector<336x128xf32>
    %33 = arith.minimumf %31, %32 : vector<336x128xf32>
    %34 = math.exp %33 : vector<336x128xf32>
    %cst_16 = arith.constant 1.000000e+00 : f32
    %35 = vector.broadcast %cst_16 : f32 to vector<336x128xf32>
    %36 = arith.addf %35, %34 : vector<336x128xf32>
    %37 = tpu.reciprocal %36 {approx = true} : vector<336x128xf32> -> vector<336x128xf32>
    %38 = arith.mulf %29, %37 : vector<336x128xf32>
    %39 = arith.truncf %38 : vector<336x128xf32> to vector<336x128xbf16>
    %c0_17 = arith.constant 0 : index
    %c0_18 = arith.constant 0 : index
    %40 = vector.load %arg5[%c0_17, %c0_18] : memref<336x128xbf16, #tpu.memory_space<vmem>>, vector<336x128xbf16>
    tpu.vector_store %arg5[%c0_17, %c0_18], %39 {strides = array<i32>} : memref<336x128xbf16, #tpu.memory_space<vmem>>, vector<336x128xbf16>,
    return
  }
  func.func @transform_0(%arg0: i32, %arg1: i32) -> (i32, i32, i32) {
    %c0_i32 = arith.constant 0 : i32
    %c0_i32_0 = arith.constant 0 : i32
    %c0_i32_1 = arith.constant 0 : i32
    return %arg1, %c0_i32, %c0_i32_0 : i32, i32, i32
  }
  func.func @transform_1(%arg0: i32, %arg1: i32) -> (i32, i32, i32) {
    %c0_i32 = arith.constant 0 : i32
    %c0_i32_0 = arith.constant 0 : i32
    %c0_i32_1 = arith.constant 0 : i32
    return %c0_i32, %c0_i32_0, %arg0 : i32, i32, i32
  }
  func.func @transform_2(%arg0: i32, %arg1: i32) -> (i32, i32) {
    %c0_i32 = arith.constant 0 : i32
    %c0_i32_0 = arith.constant 0 : i32
    return %c0_i32, %arg0 : i32, i32
  }
  func.func @transform_3(%arg0: i32, %arg1: i32) -> (i32, i32) {
    %c0_i32 = arith.constant 0 : i32
    return %arg1, %arg0 : i32, i32
  }
}

</mosaic_0001>

<bundles_post_ra>
// kernel: conv_bn_silu.1
= control target key start
LH: loop header
LB: loop body
LE: loop exit
PB: predicated region body
PF: predicated region fallthrough
CT: control target
= control target key end

     0   :  { %s3398_s12 = smov 0   ;;  %s3400_s13 = smov 0   ;;  %s4527_s0 = inlined_call_operand.vmem [shape: bf16[2,374,4], index: 0, kind: input, shape index: {}]   ;;  %s4528_s1 = inlined_call_operand.vmem [shape: bf16[3,12,128], index: 1, kind: input, shape index: {}]   ;;  %s4529_s2 = inlined_call_operand.vmem [shape: f32[1,128], index: 2, kind: input, shape index: {}]   ;;  %s4530_s3 = inlined_call_operand.vmem [shape: bf16[672,128], index: 3, kind: output, shape index: {}]  }
   0x1   :  { %s3402_s14 = smov 0  }
   0x2 LB: > { %s22_s15 = sadd.s32 1, %s3368_s13  ;;  %p2486_p0 = scmp.ge.s32.totalorder %s3372_s14, 1  ;;  %s3372_s14 = sphi %s3402_s14, %s13_s14   ;;  %s3368_s13 = sphi %s3400_s13, %s4533_s13   ;;  %s3364_s12 = sphi %s3398_s12, %s4532_s12  }
   0x3   : > { %p23_p1 = scmp.ge.s32.totalorder %s22_s15, 2  ;;  %p168_p2 = scmp.lt.s32.totalorder %s3372_s14, 3 }
   0x5   : > { %s4535_s15 = smov (%p23_p1, %s22_s15), 0  ;;  %p169_p3 = pnand %p2486_p0, %p168_p2 }
   0x6   : > { %p202_p4 = scmp.lt.s32.totalorder (!%p169_p3), %s3364_s12, 1  ;;  %vm594_vm0 = vcmask (!%p169_p3), 1046528   ;;  %vm379_vm1 = vsmask.f32 (!%p169_p3), 7424  ;;  %s3374_s21 = smov (!%p169_p3), 8   ;;  %vm955_vm2 = vcmask (!%p169_p3), 1045504  }
   0x7   : > { %172 = sbr.rel (%p169_p3) target bundleno = 653 (0x28d), region = 32  ;;  %s3375_s22 = smov (!%p169_p3), 4   ;;  %vm3377_vm3 = vmmov (!%p169_p3), 0   ;;  %vm680_vm4 = vcmask (!%p169_p3), 31744   ;;  %vm723_vm5 = vcmask (!%p169_p3), 64512   ;;  %vm891_vm6 = vcmask (!%p169_p3), 97280  }
   0x8   : > { %s214_s4 = smul.u32 (!%p169_p3), 42, %s3364_s12 }
   0xa   : > { %p4264_p5 = scmp.lt.s32.totalorder (!%p169_p3), %s214_s4, 83 }
   0xe   : > { %s203_s16 = scalar_select %p202_p4, %s3364_s12, 1 }
   0xf   : > { %s4537_s4 = smov (!%p4264_p5, %s214_s4), 83 }
  0x10   : > { %s3123_s17 = smul.u32 188, %s203_s16  ;;  %s2488_s6 = sshll.u32 %s4537_s4, 2 }
  0x11   : > { %s4295_s9 = scalar_lea.vmem %s4530_s3, %s2488_s6 }
  0x12   : > { %s3423_s20 = scalar_lea.vmem %s4527_s0, %s3123_s17 }
  0x13   : > { %v3426_v0 = vld [vmem:[%s3423_s20 + $0x60] sm:$0xff]   ;;  %v3429_v1 = vld [vmem:[%s3423_s20 + $0x68] sm:$0xff]   ;;  %v3437_v5 = vld [vmem:[%s3423_s20 + $0x10] sm:$0xff]  }
  0x14   : > { %v618_v2 = vrot.slane %v3426_v0, 1  ;;  %v620_v3 = vrot.slane %v3429_v1, 1  ;;  %v3434_v4 = vld [vmem:[%s3423_s20 + $0x8] sm:$0xff]   ;;  %v3440_v6 = vld [vmem:[%s3423_s20 + $0x18] sm:$0xff]   ;;  %v484_v7 = vshll.u32 %v3429_v1, 16  ;;  %v598_v10 = vrot.slane %v3437_v5, 1 }
  0x15   : > { %v596_v9 = vrot.slane %v3434_v4, 1  ;;  %v388_v11 = vshll.u32 %v3434_v4, 16  ;;  %v3450_v12 = vld [vmem:[%s3423_s20 + $0x70] sm:$0xff]   ;;  %v600_v13 = vrot.slane %v3440_v6, 1  ;;  %v392_v14 = vshrl.u32 %v3434_v4, 16  ;;  %v3467_v24 = vld [vmem:[%s3423_s20 + $0x20] sm:$0xff]  }
  0x16   : > { %v621_v8 = vsel %vm594_vm0, %v618_v2, %v620_v3  ;;  %v396_v15 = vshll.u32 %v3437_v5, 16  ;;  %v400_v16 = vshrl.u32 %v3437_v5, 16  ;;  %v622_v19 = vrot.slane %v3450_v12, 1  ;;  %v3481_v36 = vld [vmem:[%s3423_s20 + $0x78] sm:$0xff]   ;;  %v3495_v49 = vld [vmem:[%s3423_s20 + $0x28] sm:$0xff]   ;;  %v3498_v50 = vld [vmem:[%s3423_s20 + $0x80] sm:$0xff]  }
  0x17   : > { %662 = vrot.lane.b32.xlu0 %v621_v8, %s3374_s21  ;;  %v599_v17 = vsel %vm594_vm0, %v596_v9, %v598_v10  ;;  %v3460_v18 = vrot.slane %v388_v11, 1  ;;  %v404_v20 = vshll.u32 %v3440_v6, 16  ;;  %v486_v22 = vrot.slane %v484_v7, 1  ;;  %v3515_v7 = vld [vmem:[%s3423_s20 + $0x30] sm:$0xff]  }
  0x18   : > { %640 = vrot.lane.b32.xlu1 %v599_v17, %s3374_s21  ;;  %v398_v21 = vrot.slane %v396_v15, 1  ;;  %v488_v23 = vshrl.u32 %v3429_v1, 16  ;;  %v601_v25 = vsel %vm594_vm0, %v598_v10, %v600_v13  ;;  %v492_v28 = vshll.u32 %v3450_v12, 16  ;;  %v3525_v17 = vld [vmem:[%s3423_s20 + $0x88] sm:$0xff]  }
  0x19   : > { %v394_v26 = vor.u32 %v392_v14, %v3460_v18  ;;  %v406_v27 = vrot.slane %v404_v20, 1  ;;  %v476_v30 = vshll.u32 %v3426_v0, 16  ;;  %v480_v31 = vshrl.u32 %v3426_v0, 16 }
  0x1a   : > { %v402_v29 = vor.u32 %v400_v16, %v398_v21  ;;  %v623_v33 = vsel %vm594_vm0, %v620_v3, %v622_v19  ;;  %v494_v34 = vrot.slane %v492_v28, 1  ;;  %v490_v38 = vor.u32 %v488_v23, %v486_v22 }
  0x1b   : > { %v399_v32 = vsel %vm379_vm1, %v394_v26, %v398_v21  ;;  %v3478_v35 = vrot.slane %v476_v30, 1  ;;  %v408_v39 = vshrl.u32 %v3440_v6, 16  ;;  %v412_v40 = vshll.u32 %v3467_v24, 16 }
  0x1c   : > { %642 = vrot.lane.b32.xlu1 %v601_v25, %s3374_s21  ;;  %554 = vrot.lane.b32.xlu0 %v399_v32, %s3375_s22  ;;  %v407_v37 = vsel %vm379_vm1, %v402_v29, %v406_v27  ;;  %v602_v42 = vrot.slane %v3467_v24, 1  ;;  %v496_v43 = vshrl.u32 %v3450_v12, 16  ;;  %v500_v44 = vshll.u32 %v3481_v36, 16 }
  0x1d   : > { %v482_v41 = vor.u32 %v480_v31, %v3478_v35  ;;  %v495_v45 = vsel %vm379_vm1, %v490_v38, %v494_v34  ;;  %v410_v47 = vor.u32 %v408_v39, %v406_v27  ;;  %v414_v48 = vrot.slane %v412_v40, 1 }
  0x1e   : > { %v603_v51 = vsel %vm594_vm0, %v600_v13, %v602_v42  ;;  %v502_v52 = vrot.slane %v500_v44, 1  ;;  %v624_v53 = vrot.slane %v3481_v36, 1  ;;  %v498_v55 = vor.u32 %v496_v43, %v494_v34 }
  0x1f   : > { %v487_v46 = vsel %vm379_vm1, %v482_v41, %v486_v22  ;;  %v415_v54 = vsel %vm379_vm1, %v410_v47, %v414_v48  ;;  %v416_v56 = vshrl.u32 %v3467_v24, 16  ;;  %v420_v57 = vshll.u32 %v3495_v49, 16  ;;  %v3532_v22 = vld [vmem:[%s3423_s20 + $0x38] sm:$0xff]  }
  0x20   : > { %664 = vrot.lane.b32.xlu1 %v623_v33, %s3374_s21  ;;  %556 = vrot.lane.b32.xlu0 %v407_v37, %s3375_s22  ;;  %v625_v58 = vsel %vm594_vm0, %v622_v19, %v624_v53  ;;  %v604_v59 = vrot.slane %v3495_v49, 1  ;;  %v504_v60 = vshrl.u32 %v3481_v36, 16  ;;  %v503_v61 = vsel %vm379_vm1, %v498_v55, %v502_v52  ;;  %v3545_v37 = vld [vmem:[%s3423_s20 + $0x90] sm:$0xff]  }
  0x21   : > { %v418_v62 = vor.u32 %v416_v56, %v414_v48  ;;  %v422_v63 = vrot.slane %v420_v57, 1  ;;  %v508_v3 = vshll.u32 %v3498_v50, 16  ;;  %v626_v10 = vrot.slane %v3498_v50, 1  ;;  %v3568_v56 = vld [vmem:[%s3423_s20 + $0x98] sm:$0xff]  }
  0x22   : > { %v605_v8 = vsel %vm594_vm0, %v602_v42, %v604_v59  ;;  %v424_v11 = vshrl.u32 %v3495_v49, 16  ;;  %v506_v14 = vor.u32 %v504_v60, %v502_v52  ;;  %v428_v16 = vshll.u32 %v3515_v7, 16 }
  0x23   : > { %v423_v13 = vsel %vm379_vm1, %v418_v62, %v422_v63  ;;  %v510_v15 = vrot.slane %v508_v3, 1  ;;  %v627_v19 = vsel %vm594_vm0, %v624_v53, %v626_v10  ;;  %v606_v21 = vrot.slane %v3515_v7, 1 }
  0x24   : > { %578 = vrot.lane.b32.xlu1 %v495_v45, %s3375_s22  ;;  %576 = vrot.lane.b32.xlu0 %v487_v46, %s3375_s22  ;;  %v426_v20 = vor.u32 %v424_v11, %v422_v63  ;;  %v430_v25 = vrot.slane %v428_v16, 1  ;;  %v512_v26 = vshrl.u32 %v3498_v50, 16  ;;  %v516_v27 = vshll.u32 %v3525_v17, 16  ;;  %v3555_v45 = vld [vmem:[%s3423_s20 + $0x40] sm:$0xff]   ;;  %v3176_v46 = vld [vmem:[%s4528_s1 + $0x8] sm:$0x3f]  }
  0x25   : > { %v511_v23 = vsel %vm379_vm1, %v506_v14, %v510_v15  ;;  %v607_v28 = vsel %vm594_vm0, %v604_v59, %v606_v21  ;;  %v432_v29 = vshrl.u32 %v3515_v7, 16  ;;  %v436_v30 = vshll.u32 %v3532_v22, 16 }
  0x26   : > { %v431_v31 = vsel %vm379_vm1, %v426_v20, %v430_v25  ;;  %v514_v32 = vor.u32 %v512_v26, %v510_v15  ;;  %v518_v33 = vrot.slane %v516_v27, 1  ;;  %v628_v34 = vrot.slane %v3525_v17, 1 }
  0x27   : > { %v608_v38 = vrot.slane %v3532_v22, 1  ;;  %v434_v39 = vor.u32 %v432_v29, %v430_v25  ;;  %v438_v40 = vrot.slane %v436_v30, 1  ;;  %v520_v41 = vshrl.u32 %v3525_v17, 16 }
  0x28   : > { %558 = vrot.lane.b32.xlu0 %v415_v54, %s3375_s22  ;;  %644 = vrot.lane.b32.xlu1 %v603_v51, %s3374_s21  ;;  %v519_v42 = vsel %vm379_vm1, %v514_v32, %v518_v33  ;;  %v629_v43 = vsel %vm594_vm0, %v626_v10, %v628_v34  ;;  %v524_v44 = vshll.u32 %v3545_v37, 16  ;;  %v630_v52 = vrot.slane %v3545_v37, 1  ;;  %v3585_v10 = vld [vmem:[%s3423_s20 + $0x48] sm:$0xff]  }
  0x29   : > { %v609_v47 = vsel %vm594_vm0, %v606_v21, %v608_v38  ;;  %v439_v48 = vsel %vm379_vm1, %v434_v39, %v438_v40  ;;  %v522_v51 = vor.u32 %v520_v41, %v518_v33  ;;  %v440_v53 = vshrl.u32 %v3532_v22, 16  ;;  %v3597_v21 = vld [vmem:[%s3423_s20 + $0xa0] sm:$0xff]   ;;  %v3610_v32 = vld [vmem:[%s3423_s20 + $0xa8] sm:$0xf]  ;;  %v267_v33 = vld [vmem:[%s3423_s20 + $0xac] sm:$0xf] }
  0x2a   : > { %v526_v54 = vrot.slane %v524_v44, 1  ;;  %v444_v55 = vshll.u32 %v3555_v45, 16  ;;  %v3376_v57 = vmov 0.0   ;;  %v631_v59 = vsel %vm594_vm0, %v628_v34, %v630_v52 }
  0x2b   : > { %2863 = vmatprep.subr.bf16.mxu0 %v3376_v57  ;;  %3121 = vmatprep.subr.bf16.mxu1 %v3376_v57  ;;  %v610_v60 = vrot.slane %v3555_v45, 1  ;;  %v442_v63 = vor.u32 %v440_v53, %v438_v40  ;;  %v632_v14 = vrot.slane %v3568_v56, 1  ;;  %v452_v20 = vshll.u32 %v3585_v10, 16 }
  0x2c   : > { %580 = vrot.lane.b32.xlu0 %v503_v61, %s3375_s22  ;;  %666 = vrot.lane.b32.xlu1 %v625_v58, %s3374_s21  ;;  %v957_v58 = vsel %vm955_vm2, %v3176_v46, 0  ;;  %v528_v61 = vshrl.u32 %v3545_v37, 16  ;;  %v527_v62 = vsel %vm379_vm1, %v522_v51, %v526_v54  ;;  %v446_v3 = vrot.slane %v444_v55, 1  ;;  %v3634_v55 = vld [vmem:[%s3423_s20 + $0x58] sm:$0xff]  }
  0x2d   : > { %2865 = vmatprep.mubr.msk.bf16.mxu0 %vm3377_vm3, %v3376_v57  ;;  %2909 = vmatprep.mubr.msk.bf16.mxu1 %vm3377_vm3, %v3376_v57  ;;  %v611_v11 = vsel %vm594_vm0, %v608_v38, %v610_v60  ;;  %v612_v25 = vrot.slane %v3585_v10, 1  ;;  %v536_v26 = vshrl.u32 %v3568_v56, 16  ;;  %v454_v29 = vrot.slane %v452_v20, 1 }
  0x2e   : > { %2864 = vmatpush3.bf16.msra.mxu0 %v957_v58  ;;  %3122 = vmatpush3.bf16.msra.mxu1 %v957_v58  ;;  %v447_v15 = vsel %vm379_vm1, %v442_v63, %v446_v3  ;;  %v540_v30 = vshll.u32 %v3597_v21, 16  ;;  %v3617_v39 = vrot.slane %v3597_v21, 1  ;;  %v456_v40 = vshrl.u32 %v3585_v10, 16  ;;  %v268_v58 = vld [vmem:[%s3423_s20 + $0xb0] sm:$0xf] }
  0x2f   : > { %3035 = vmatprep.subr.bf16.mxu0 %v3376_v57  ;;  %2949 = vmatprep.subr.bf16.mxu1 %v3376_v57  ;;  %v613_v34 = vsel %vm594_vm0, %v610_v60, %v612_v25  ;;  %v3623_v44 = vcombine.low %v3610_v32, %v267_v33  ;;  %v3664_v33 = vld [vmem:[%s3423_s20] sm:$0xff]  }
  0x30   : > { %560 = vrot.lane.b32.xlu0 %v423_v13, %s3375_s22  ;;  %646 = vrot.lane.b32.xlu1 %v605_v8, %s3374_s21  ;;  %v532_v8 = vshll.u32 %v3568_v56, 16  ;;  %v530_v13 = vor.u32 %v528_v61, %v526_v54  ;;  %v635_v46 = vsel %vm594_vm0, %v632_v14, %v3617_v39 }
  0x31   : > { %v775_v54 = vshll.u32 %v3623_v44, 16  ;;  %v796_v61 = vrot.slane %v3623_v44, 1  ;;  %v779_v20 = vshrl.u32 %v3623_v44, 16 }
  0x32   : > { %v534_v16 = vrot.slane %v532_v8, 1  ;;  %v468_v8 = vshll.u32 %v3634_v55, 16 }
  0x34   : > { %582 = vrot.lane.b32.xlu0 %v511_v23, %s3375_s22  ;;  %668 = vrot.lane.b32.xlu1 %v627_v19, %s3374_s21  ;;  %v448_v19 = vshrl.u32 %v3555_v45, 16  ;;  %v633_v23 = vsel %vm594_vm0, %v630_v52, %v632_v14  ;;  %v535_v27 = vsel %vm379_vm1, %v530_v13, %v534_v16  ;;  %v538_v38 = vor.u32 %v536_v26, %v534_v16 }
  0x35   : > { %v458_v52 = vor.u32 %v456_v40, %v454_v29  ;;  %v797_v13 = vsel %vm594_vm0, %v3617_v39, %v796_v61 }
  0x38   : > { %562 = vrot.lane.b32.xlu0 %v431_v31, %s3375_s22  ;;  %648 = vrot.lane.b32.xlu1 %v607_v28, %s3374_s21  ;;  %v450_v28 = vor.u32 %v448_v19, %v446_v3  ;;  %v3607_v31 = vld [vmem:[%s3423_s20 + $0x50] sm:$0xff]   ;;  %v777_v3 = vrot.slane %v775_v54, 1  ;;  %v470_v19 = vrot.slane %v468_v8, 1 }
  0x3a   : > { %v455_v41 = vsel %vm379_vm1, %v450_v28, %v454_v29  ;;  %v781_v28 = vor.u32 %v779_v20, %v777_v3 }
  0x3c   : > { %584 = vrot.lane.b32.xlu0 %v519_v42, %s3375_s22  ;;  %670 = vrot.lane.b32.xlu1 %v629_v43, %s3374_s21  ;;  %v542_v42 = vrot.slane %v540_v30, 1  ;;  %v460_v43 = vshll.u32 %v3607_v31, 16  ;;  %v472_v30 = vshrl.u32 %v3634_v55, 16 }
  0x3e   : > { %v543_v51 = vsel %vm379_vm1, %v538_v38, %v542_v42  ;;  %v462_v53 = vrot.slane %v460_v43, 1  ;;  %v474_v40 = vor.u32 %v472_v30, %v470_v19 }
  0x40   : > { %564 = vrot.lane.b32.xlu0 %v439_v48, %s3375_s22  ;;  %650 = vrot.lane.b32.xlu1 %v609_v47, %s3374_s21  ;;  %v614_v47 = vrot.slane %v3607_v31, 1  ;;  %v544_v48 = vshrl.u32 %v3597_v21, 16  ;;  %v463_v63 = vsel %vm379_vm1, %v458_v52, %v462_v53 }
  0x42   : > { %v3640_v60 = vor.u32 %v544_v48, %v542_v42  ;;  %v269_v42 = vld [vmem:[%s3423_s20 + $0xb4] sm:$0xf]  ;;  %v381_v48 = vshrl.u32 %v3664_v33, 16 }
  0x43   : > { %v3681_v52 = vcombine.low %v268_v58, %v269_v42 }
  0x44   : > { %586 = vrot.lane.b32.xlu0 %v527_v62, %s3375_s22  ;;  %672 = vrot.lane.b32.xlu1 %v631_v59, %s3374_s21  ;;  %v615_v59 = vsel %vm594_vm0, %v612_v25, %v614_v47  ;;  %v464_v62 = vshrl.u32 %v3607_v31, 16  ;;  %v778_v16 = vsel %vm379_vm1, %v3640_v60, %v777_v3 }
  0x46   : > { %v466_v14 = vor.u32 %v464_v62, %v462_v53 }
  0x48   : > { %566 = vrot.lane.b32.xlu0 %v447_v15, %s3375_s22  ;;  %652 = vrot.lane.b32.xlu1 %v611_v11, %s3374_s21  ;;  %v3646_v11 = vcombine.low %v268_v58, %v268_v58  ;;  %v616_v15 = vrot.slane %v3634_v55, 1 }
  0x4a   : > { %v617_v25 = vsel %vm594_vm0, %v614_v47, %v616_v15  ;;  %v798_v26 = vrot.slane %v3646_v11, 1  ;;  %v619_v43 = vsel %vm594_vm0, %v616_v15, %v618_v2  ;;  %v479_v47 = vsel %vm379_vm1, %v474_v40, %v3478_v35 }
  0x4b   : > { %v1418_v2 = vshll.u32 %v3681_v52, 16 }
  0x4c   : > { %588 = vrot.lane.b32.xlu0 %v535_v27, %s3375_s22  ;;  %674 = vrot.lane.b32.xlu1 %v633_v23, %s3374_s21  ;;  %v783_v23 = vshll.u32 %v3646_v11, 16  ;;  %v471_v27 = vsel %vm379_vm1, %v466_v14, %v470_v19  ;;  %v799_v38 = vsel %vm594_vm0, %v796_v61, %v798_v26 }
  0x4d   : > { %v1420_v62 = vrot.slane %v1418_v2, 1 }
  0x4e   : > { %v785_v29 = vrot.slane %v783_v23, 1 }
  0x4f   : > { %v1421_v3 = vsel %vm379_vm1, %v781_v28, %v1420_v62 }
  0x50   : > { %568 = vrot.lane.b32.xlu0 %v455_v41, %s3375_s22  ;;  %654 = vrot.lane.b32.xlu1 %v613_v34, %s3374_s21  ;;  %v786_v34 = vsel %vm379_vm1, %v781_v28, %v785_v29  ;;  %v383_v41 = vshll.u32 %v3664_v33, 16 }
  0x54   : > { %590 = vrot.lane.b32.xlu0 %v543_v51, %s3375_s22  ;;  %676 = vrot.lane.b32.xlu1 %v635_v46, %s3374_s21  ;;  %v787_v46 = vshrl.u32 %v3646_v11, 16  ;;  %v385_v51 = vrot.slane %v383_v41, 1 }
  0x56   : > { %v789_v53 = vor.u32 %v787_v46, %v785_v29  ;;  %v386_v54 = vor.u32 %v385_v51, %v381_v48 }
  0x58   : > { %570 = vrot.lane.b32.xlu0 %v463_v63, %s3375_s22  ;;  %656 = vrot.lane.b32.xlu1 %v615_v59, %s3374_s21  ;;  %v595_v59 = vrot.slane %v3664_v33, 1  ;;  %v391_v35 = vsel %vm379_vm1, %v386_v54, %v3460_v18  ;;  %v1439_v63 = vrot.slane %v3681_v52, 1  ;;  %v3702_v18 = vld [vmem:[%s3423_s20 + $0xb8] ss:$0 sps:$4 sm:$0x77]  }
  0x59   : > { %v1430_v23 = vshrl.u32 %v3702_v18, 16 }
  0x5a   : > { %v597_v58 = vsel %vm594_vm0, %v595_v59, %v596_v9  ;;  %v1440_v8 = vsel %vm594_vm0, %v796_v61, %v1439_v63  ;;  %v1426_v9 = vshll.u32 %v3702_v18, 16 }
  0x5c   : > { %790 = vrot.lane.b32.xlu0 %v778_v16, %s3375_s22  ;;  %800 = vrot.lane.b32.xlu1 %v797_v13, %s3374_s21  ;;  %v1422_v13 = vshrl.u32 %v3681_v52, 16  ;;  %v1428_v15 = vrot.slane %v1426_v9, 1  ;;  %v1441_v16 = vrot.slane %v3702_v18, 1 }
  0x5e   : > { %v1424_v14 = vor.u32 %v1422_v13, %v1420_v62  ;;  %v1442_v61 = vsel %vm594_vm0, %v1439_v63, %v1441_v16 }
  0x60   : > { %572 = vrot.lane.b32.xlu0 %v471_v27, %s3375_s22  ;;  %658 = vrot.lane.b32.xlu1 %v617_v25, %s3374_s21  ;;  %v1429_v19 = vsel %vm379_vm1, %v1424_v14, %v1428_v15  ;;  %v2510_v27 = vcombine.low %v3610_v32, %v3610_v32  ;;  %v3177_v32 = vld [vmem:[%s4528_s1 + $0x10] sm:$0x3f]  }
  0x61   : > { %v1580_v59 = vsel %vm955_vm2, %v3177_v32, 0 }
  0x62   : > { %v548_v30 = vshll.u32 %v2510_v27, 16 }
  0x64   : > { %792 = vrot.lane.b32.xlu0 %v786_v34, %s3375_s22  ;;  %802 = vrot.lane.b32.xlu1 %v799_v38, %s3374_s21  ;;  %v550_v38 = vrot.slane %v548_v30, 1 }
  0x68   : > { %574 = vrot.lane.b32.xlu0 %v479_v47, %s3375_s22  ;;  %660 = vrot.lane.b32.xlu1 %v619_v43, %s3374_s21  ;;  %v551_v43 = vsel %vm379_vm1, %v3640_v60, %v550_v38  ;;  %v636_v47 = vrot.slane %v2510_v27, 1  ;;  %v3178_v60 = vld [vmem:[%s4528_s1] sm:$0x3f]  }
  0x6c   : > { %794 = vrot.lane.b32.xlu0 %v789_v53, %s3375_s22  ;;  %804 = vrot.lane.b32.xlu1 %v798_v26, %s3374_s21  ;;  %v1432_v26 = vor.u32 %v1430_v23, %v1428_v15 }
  0x70   : > { %552 = vrot.lane.b32.xlu0 %v391_v35, %s3375_s22  ;;  %638 = vrot.lane.b32.xlu1 %v597_v58, %s3374_s21 }
  0x74   : > { %1433 = vrot.lane.b32.xlu0 %v1421_v3, %s3375_s22  ;;  %1443 = vrot.lane.b32.xlu1 %v1440_v8, %s3374_s21  ;;  %v1208_v8 = vsel %vm955_vm2, %v3178_v60, 0 }
  0x78   : > { %1435 = vrot.lane.b32.xlu0 %v1429_v19, %s3375_s22  ;;  %1445 = vrot.lane.b32.xlu1 %v1442_v61, %s3374_s21 }
  0x7c   : > { %1437 = vrot.lane.b32.xlu0 %v1432_v26, %s3375_s22  ;;  %592 = vrot.lane.b32.xlu1 %v551_v43, %s3375_s22 }
  0x80   : > { %1447 = vrot.lane.b32.xlu0 %v1441_v16, %s3374_s21 }
  0x89   : > { %v663_v20 = vpop.permute.xlu0 %662 }
  0x8a   : > { %v641_v25 = vpop.permute.xlu1 %640 }
  0x8e   : > { %v643_v28 = vpop.permute.xlu1 %642  ;;  %v555_v29 = vpop.permute.xlu0 %554 }
  0x8f   : > { %v684_v34 = vsel %vm680_vm4, %v3434_v4, %v555_v29 }
  0x90   : > { %v3719_v40 = vsel %vm723_vm5, %v684_v34, %v641_v25 }
  0x91   : > { %v843_v48 = vrot.slane %v3719_v40, 1 }
  0x92   : > { %v665_v41 = vpop.permute.xlu1 %664  ;;  %v557_v42 = vpop.permute.xlu0 %556 }
  0x93   : > { %v686_v46 = vsel %vm680_vm4, %v3437_v5, %v557_v42  ;;  %v637_v5 = vsel %vm594_vm0, %v3617_v39, %v636_v47 }
  0x94   : > { %v3730_v4 = vsel %vm723_vm5, %v686_v46, %v643_v28  ;;  %678 = vrot.lane.b32.xlu1 %v637_v5, %s3374_s21 }
  0x95   : > { %v844_v51 = vrot.slane %v3730_v4, 1 }
  0x96   : > { %v579_v53 = vpop.permute.xlu1 %578  ;;  %v577_v54 = vpop.permute.xlu0 %576 }
  0x97   : > { %v708_v2 = vsel %vm680_vm4, %v3429_v1, %v579_v53  ;;  %v706_v35 = vsel %vm680_vm4, %v3426_v0, %v577_v54  ;;  %v845_v58 = vsel %vm594_vm0, %v843_v48, %v844_v51 }
  0x98   : > { %v3747_v62 = vsel %vm723_vm5, %v708_v2, %v665_v41  ;;  %v3750_v63 = vsel %vm723_vm5, %v706_v35, %v663_v20  ;;  %2866 = vmatmul.mubr.msk.bf16.vlgmr.msra.gmra.mrb[0].mxu0 %vm891_vm6, %v845_v58 }
  0x99   : > { %v866_v39 = vrot.slane %v3747_v62, 1  ;;  %v864_v3 = vrot.slane %v3750_v63, 1  ;;  %3036 = vmatpush3.bf16.msra.mxu0 %v1580_v59  ;;  %2869 = vmatprep.mubr.msk.bf16.mxu0 %vm3377_vm3, %v3376_v57 }
  0x9a   : > { %v559_v0 = vpop.permute.xlu0 %558  ;;  %v645_v1 = vpop.permute.xlu1 %644 }
  0x9b   : > { %v688_v13 = vsel %vm680_vm4, %v3440_v6, %v559_v0  ;;  %v867_v9 = vsel %vm594_vm0, %v864_v3, %v866_v39 }
  0x9c   : > { %v3764_v14 = vsel %vm723_vm5, %v688_v13, %v645_v1  ;;  %2910 = vmatmul.mubr.msk.bf16.vlgmr.msra.gmra.mrb[0].mxu1 %vm891_vm6, %v867_v9 }
  0x9d   : > { %v846_v15 = vrot.slane %v3764_v14, 1  ;;  %2950 = vmatpush3.bf16.msra.mxu1 %v1208_v8  ;;  %2913 = vmatprep.mubr.msk.bf16.mxu1 %vm3377_vm3, %v3376_v57 }
  0x9e   : > { %v581_v16 = vpop.permute.xlu0 %580  ;;  %v667_v19 = vpop.permute.xlu1 %666 }
  0x9f   : > { %v710_v6 = vsel %vm680_vm4, %v3450_v12, %v581_v16  ;;  %v847_v20 = vsel %vm594_vm0, %v844_v51, %v846_v15 }
  0xa0   : > { %v3774_v61 = vsel %vm723_vm5, %v710_v6, %v667_v19  ;;  %2870 = vmatmul.mubr.msk.bf16.gmra.mrb[4].mxu0 %vm891_vm6, %v847_v20 }
  0xa1   : > { %v868_v23 = vrot.slane %v3774_v61, 1  ;;  %2873 = vmatprep.mubr.msk.bf16.mxu0 %vm3377_vm3, %v3376_v57 }
  0xa2   : > { %v561_v25 = vpop.permute.xlu0 %560  ;;  %v647_v26 = vpop.permute.xlu1 %646 }
  0xa3   : > { %v690_v27 = vsel %vm680_vm4, %v3467_v24, %v561_v25  ;;  %v869_v28 = vsel %vm594_vm0, %v866_v39, %v868_v23 }
  0xa4   : > { %v3784_v12 = vsel %vm723_vm5, %v690_v27, %v647_v26  ;;  %2914 = vmatmul.mubr.msk.bf16.gmra.mrb[4].mxu1 %vm891_vm6, %v869_v28 }
  0xa5   : > { %v848_v29 = vrot.slane %v3784_v12, 1  ;;  %2917 = vmatprep.mubr.msk.bf16.mxu1 %vm3377_vm3, %v3376_v57 }
  0xa6   : > { %v583_v30 = vpop.permute.xlu0 %582  ;;  %v669_v34 = vpop.permute.xlu1 %668 }
  0xa7   : > { %v712_v38 = vsel %vm680_vm4, %v3481_v36, %v583_v30  ;;  %v849_v41 = vsel %vm594_vm0, %v846_v15, %v848_v29 }
  0xa8   : > { %v3794_v24 = vsel %vm723_vm5, %v712_v38, %v669_v34  ;;  %2874 = vmatmul.mubr.msk.bf16.gmra.mrb[8].mxu0 %vm891_vm6, %v849_v41 }
  0xa9   : > { %v870_v42 = vrot.slane %v3794_v24, 1  ;;  %2877 = vmatprep.mubr.msk.bf16.mxu0 %vm3377_vm3, %v3376_v57 }
  0xaa   : > { %v563_v32 = vpop.permute.xlu0 %562  ;;  %v649_v43 = vpop.permute.xlu1 %648 }
  0xab   : > { %v692_v46 = vsel %vm680_vm4, %v3495_v49, %v563_v32  ;;  %v871_v47 = vsel %vm594_vm0, %v868_v23, %v870_v42 }
  0xac   : > { %v3804_v36 = vsel %vm723_vm5, %v692_v46, %v649_v43  ;;  %2918 = vmatmul.mubr.msk.bf16.gmra.mrb[8].mxu1 %vm891_vm6, %v871_v47 }
  0xad   : > { %v850_v48 = vrot.slane %v3804_v36, 1  ;;  %2921 = vmatprep.mubr.msk.bf16.mxu1 %vm3377_vm3, %v3376_v57 }
  0xae   : > { %v585_v51 = vpop.permute.xlu0 %584  ;;  %v671_v53 = vpop.permute.xlu1 %670 }
  0xaf   : > { %v714_v54 = vsel %vm680_vm4, %v3498_v50, %v585_v51  ;;  %v851_v59 = vsel %vm594_vm0, %v848_v29, %v850_v48 }
  0xb0   : > { %v3814_v49 = vsel %vm723_vm5, %v714_v54, %v671_v53  ;;  %2878 = vmatmul.mubr.msk.bf16.gmra.mrb[12].mxu0 %vm891_vm6, %v851_v59 }
  0xb1   : > { %v872_v60 = vrot.slane %v3814_v49, 1  ;;  %2881 = vmatprep.mubr.msk.bf16.mxu0 %vm3377_vm3, %v3376_v57 }
  0xb2   : > { %v565_v5 = vpop.permute.xlu0 %564  ;;  %v651_v2 = vpop.permute.xlu1 %650 }
  0xb3   : > { %v694_v35 = vsel %vm680_vm4, %v3515_v7, %v565_v5  ;;  %v873_v58 = vsel %vm594_vm0, %v870_v42, %v872_v60 }
  0xb4   : > { %v3824_v50 = vsel %vm723_vm5, %v694_v35, %v651_v2  ;;  %2922 = vmatmul.mubr.msk.bf16.gmra.mrb[12].mxu1 %vm891_vm6, %v873_v58 }
  0xb5   : > { %v852_v39 = vrot.slane %v3824_v50, 1  ;;  %2925 = vmatprep.mubr.msk.bf16.mxu1 %vm3377_vm3, %v3376_v57 }
  0xb6   : > { %v587_v0 = vpop.permute.xlu0 %586  ;;  %v673_v1 = vpop.permute.xlu1 %672 }
  0xb7   : > { %v716_v8 = vsel %vm680_vm4, %v3525_v17, %v587_v0  ;;  %v853_v13 = vsel %vm594_vm0, %v850_v48, %v852_v39 }
  0xb8   : > { %v3834_v7 = vsel %vm723_vm5, %v716_v8, %v673_v1  ;;  %2882 = vmatmul.mubr.msk.bf16.gmra.mrb[16].mxu0 %vm891_vm6, %v853_v13 }
  0xb9   : > { %v874_v9 = vrot.slane %v3834_v7, 1  ;;  %2885 = vmatprep.mubr.msk.bf16.mxu0 %vm3377_vm3, %v3376_v57 }
  0xba   : > { %v567_v15 = vpop.permute.xlu0 %566  ;;  %v653_v16 = vpop.permute.xlu1 %652 }
  0xbb   : > { %v696_v19 = vsel %vm680_vm4, %v3532_v22, %v567_v15  ;;  %v875_v6 = vsel %vm594_vm0, %v872_v60, %v874_v9 }
  0xbc   : > { %v3844_v17 = vsel %vm723_vm5, %v696_v19, %v653_v16  ;;  %2926 = vmatmul.mubr.msk.bf16.gmra.mrb[16].mxu1 %vm891_vm6, %v875_v6 }
  0xbd   : > { %v854_v20 = vrot.slane %v3844_v17, 1  ;;  %2929 = vmatprep.mubr.msk.bf16.mxu1 %vm3377_vm3, %v3376_v57 }
  0xbe   : > { %v589_v23 = vpop.permute.xlu0 %588  ;;  %v675_v25 = vpop.permute.xlu1 %674 }
  0xbf   : > { %v718_v26 = vsel %vm680_vm4, %v3545_v37, %v589_v23  ;;  %v855_v27 = vsel %vm594_vm0, %v852_v39, %v854_v20 }
  0xc0   : > { %v3854_v22 = vsel %vm723_vm5, %v718_v26, %v675_v25  ;;  %2886 = vmatmul.mubr.msk.bf16.gmra.mrb[20].mxu0 %vm891_vm6, %v855_v27 }
  0xc1   : > { %v876_v28 = vrot.slane %v3854_v22, 1  ;;  %2889 = vmatprep.mubr.msk.bf16.mxu0 %vm3377_vm3, %v3376_v57 }
  0xc2   : > { %v569_v29 = vpop.permute.xlu0 %568  ;;  %v655_v30 = vpop.permute.xlu1 %654 }
  0xc3   : > { %v698_v34 = vsel %vm680_vm4, %v3555_v45, %v569_v29  ;;  %v877_v38 = vsel %vm594_vm0, %v874_v9, %v876_v28 }
  0xc4   : > { %v3864_v37 = vsel %vm723_vm5, %v698_v34, %v655_v30  ;;  %2930 = vmatmul.mubr.msk.bf16.gmra.mrb[20].mxu1 %vm891_vm6, %v877_v38 }
  0xc5   : > { %v856_v41 = vrot.slane %v3864_v37, 1  ;;  %2933 = vmatprep.mubr.msk.bf16.mxu1 %vm3377_vm3, %v3376_v57 }
  0xc6   : > { %v591_v42 = vpop.permute.xlu0 %590  ;;  %v677_v32 = vpop.permute.xlu1 %676 }
  0xc7   : > { %v720_v43 = vsel %vm680_vm4, %v3568_v56, %v591_v42  ;;  %v857_v46 = vsel %vm594_vm0, %v854_v20, %v856_v41 }
  0xc8   : > { %v3874_v45 = vsel %vm723_vm5, %v720_v43, %v677_v32  ;;  %2890 = vmatmul.mubr.msk.bf16.gmra.mrb[24].mxu0 %vm891_vm6, %v857_v46 }
  0xc9   : > { %v878_v47 = vrot.slane %v3874_v45, 1  ;;  %2893 = vmatprep.mubr.msk.bf16.mxu0 %vm3377_vm3, %v3376_v57 }
  0xca   : > { %v571_v48 = vpop.permute.xlu0 %570  ;;  %v657_v51 = vpop.permute.xlu1 %656 }
  0xcb   : > { %v700_v53 = vsel %vm680_vm4, %v3585_v10, %v571_v48  ;;  %v879_v54 = vsel %vm594_vm0, %v876_v28, %v878_v47 }
  0xcc   : > { %v3884_v56 = vsel %vm723_vm5, %v700_v53, %v657_v51  ;;  %2934 = vmatmul.mubr.msk.bf16.gmra.mrb[24].mxu1 %vm891_vm6, %v879_v54  ;;  %v1469_v51 = vrot.slane %v3764_v14, 2  ;;  %v1468_v53 = vrot.slane %v3730_v4, 2 }
  0xcd   : > { %v858_v59 = vrot.slane %v3884_v56, 1  ;;  %2937 = vmatprep.mubr.msk.bf16.mxu1 %vm3377_vm3, %v3376_v57 }
  0xce   : > { %v791_v60 = vpop.permute.xlu0 %790  ;;  %v801_v5 = vpop.permute.xlu1 %800 }
  0xcf   : > { %v807_v2 = vsel %vm680_vm4, %v3597_v21, %v791_v60  ;;  %v859_v35 = vsel %vm594_vm0, %v856_v41, %v858_v59  ;;  %v1475_v60 = vrot.slane %v3824_v50, 2 }
  0xd0   : > { %v3894_v10 = vsel %vm723_vm5, %v807_v2, %v801_v5  ;;  %2894 = vmatmul.mubr.msk.bf16.gmra.mrb[28].mxu0 %vm891_vm6, %v859_v35  ;;  %v1477_v5 = vrot.slane %v3844_v17, 2  ;;  %v1479_v2 = vrot.slane %v3864_v37, 2  ;;  %v1481_v35 = vrot.slane %v3884_v56, 2 }
  0xd1   : > { %v880_v58 = vrot.slane %v3894_v10, 1  ;;  %2897 = vmatprep.mubr.msk.bf16.mxu0 %vm3377_vm3, %v3376_v57 }
  0xd2   : > { %v573_v39 = vpop.permute.xlu0 %572  ;;  %v659_v0 = vpop.permute.xlu1 %658 }
  0xd3   : > { %v702_v1 = vsel %vm680_vm4, %v3607_v31, %v573_v39  ;;  %v881_v8 = vsel %vm594_vm0, %v878_v47, %v880_v58 }
  0xd4   : > { %v3904_v13 = vsel %vm723_vm5, %v702_v1, %v659_v0  ;;  %2938 = vmatmul.mubr.msk.bf16.gmra.mrb[28].mxu1 %vm891_vm6, %v881_v8  ;;  %v1487_v0 = vrot.slane %v3750_v63, 2  ;;  %v1489_v1 = vrot.slane %v3747_v62, 2  ;;  %v1491_v8 = vrot.slane %v3774_v61, 2 }
  0xd5   : > { %v860_v9 = vrot.slane %v3904_v13, 1  ;;  %2941 = vmatprep.mubr.msk.bf16.mxu1 %vm3377_vm3, %v3376_v57 }
  0xd6   : > { %v793_v15 = vpop.permute.xlu0 %792  ;;  %v803_v16 = vpop.permute.xlu1 %802 }
  0xd7   : > { %v809_v19 = vsel %vm680_vm4, %v3623_v44, %v793_v15  ;;  %v861_v6 = vsel %vm594_vm0, %v858_v59, %v860_v9  ;;  %v1473_v59 = vrot.slane %v3804_v36, 2 }
  0xd8   : > { %v815_v31 = vsel %vm723_vm5, %v809_v19, %v803_v16  ;;  %2898 = vmatmul.mubr.msk.bf16.gmra.mrb[32].mxu0 %vm891_vm6, %v861_v6  ;;  %v1495_v16 = vrot.slane %v3814_v49, 2  ;;  %v1497_v19 = vrot.slane %v3834_v7, 2  ;;  %v1499_v6 = vrot.slane %v3854_v22, 2 }
  0xd9   : > { %v882_v20 = vrot.slane %v815_v31, 1  ;;  %2901 = vmatprep.mubr.msk.bf16.mxu0 %vm3377_vm3, %v3376_v57  ;;  %v1501_v31 = vrot.slane %v3874_v45, 2 }
  0xda   : > { %v575_v23 = vpop.permute.xlu0 %574  ;;  %v661_v25 = vpop.permute.xlu1 %660 }
  0xdb   : > { %v704_v26 = vsel %vm680_vm4, %v3634_v55, %v575_v23  ;;  %v883_v27 = vsel %vm594_vm0, %v880_v58, %v882_v20  ;;  %v1483_v58 = vrot.slane %v3904_v13, 2 }
  0xdc   : > { %v3921_v28 = vsel %vm723_vm5, %v704_v26, %v661_v25  ;;  %2942 = vmatmul.mubr.msk.bf16.gmra.mrb[32].mxu1 %vm891_vm6, %v883_v27  ;;  %v1502_v27 = vsel %vm955_vm2, %v1499_v6, %v1501_v31 }
  0xdd   : > { %v862_v29 = vrot.slane %v3921_v28, 1  ;;  %2945 = vmatprep.mubr.msk.bf16.mxu1 %vm3377_vm3, %v3376_v57  ;;  %v1485_v39 = vrot.slane %v3921_v28, 2 }
  0xde   : > { %v795_v30 = vpop.permute.xlu0 %794  ;;  %v805_v34 = vpop.permute.xlu1 %804 }
  0xdf   : > { %v811_v38 = vsel %vm680_vm4, %v3646_v11, %v795_v30  ;;  %v863_v41 = vsel %vm594_vm0, %v860_v9, %v862_v29  ;;  %v865_v46 = vsel %vm594_vm0, %v862_v29, %v864_v3  ;;  %v1471_v3 = vrot.slane %v3784_v12, 2 }
  0xe0   : > { %v817_v55 = vsel %vm723_vm5, %v811_v38, %v805_v34  ;;  %2902 = vmatmul.mubr.msk.bf16.gmra.mrb[36].mxu0 %vm891_vm6, %v863_v41  ;;  %v1493_v9 = vrot.slane %v3794_v24, 2  ;;  %v1503_v34 = vrot.slane %v3894_v10, 2 }
  0xe1   : > { %v884_v42 = vrot.slane %v817_v55, 1  ;;  %2905 = vmatprep.mubr.msk.bf16.mxu0 %vm3377_vm3, %v3376_v57  ;;  %v1472_v54 = vsel %vm955_vm2, %v1469_v51, %v1471_v3 }
  0xe2   : > { %v553_v43 = vpop.permute.xlu0 %552  ;;  %v639_v47 = vpop.permute.xlu1 %638  ;;  %v1494_v15 = vsel %vm955_vm2, %v1491_v8, %v1493_v9  ;;  %v1504_v10 = vsel %vm955_vm2, %v1501_v31, %v1503_v34 }
  0xe3   : > { %v885_v32 = vsel %vm594_vm0, %v882_v20, %v884_v42  ;;  %v682_v11 = vsel %vm680_vm4, %v3664_v33, %v553_v43  ;;  %v1470_v33 = vsel %vm955_vm2, %v1468_v53, %v1469_v51 }
  0xe4   : > { %2946 = vmatmul.mubr.msk.bf16.gmra.mrb[36].mxu1 %vm891_vm6, %v885_v32  ;;  %v725_v48 = vsel %vm723_vm5, %v682_v11, %v639_v47 }
  0xe5   : > { %2951 = vmatprep.mubr.msk.bf16.mxu1 %vm3377_vm3, %v3376_v57 }
  0xe6   : > { %v1434_v30 = vpop.permute.xlu0 %1433  ;;  %v1444_v42 = vpop.permute.xlu1 %1443 }
  0xe7   : > { %v1450_v55 = vsel %vm680_vm4, %v3623_v44, %v1434_v30 }
  0xe8   : > { %2906 = vmatmul.mubr.msk.bf16.gmra.mrb[40].mxu0 %vm891_vm6, %v865_v46  ;;  %v1456_v46 = vsel %vm723_vm5, %v1450_v55, %v1444_v42 }
  0xe9   : > { %3037 = vmatprep.mubr.msk.bf16.mxu0 %vm3377_vm3, %v3376_v57  ;;  %v1505_v51 = vrot.slane %v1456_v46, 2 }
  0xec   : > { %2952 = vmatmul.mubr.msk.bf16.vlgmr.msra.gmra.mrb[40].mxu1 %vm891_vm6, %v725_v48  ;;  %v1436_v48 = vpop.permute.xlu0 %1435 }
  0xed   : > { %2955 = vmatprep.mubr.msk.bf16.mxu1 %vm3377_vm3, %v3376_v57 }
  0xf0   : > { %3038 = vmatmul.mubr.msk.bf16.vlgmr.msra.gmra.mrb[44].mxu0 %vm891_vm6, %v1470_v33  ;;  %v1446_v33 = vpop.permute.xlu1 %1445 }
  0xf1   : > { %3041 = vmatprep.mubr.msk.bf16.mxu0 %vm3377_vm3, %v3376_v57 }
  0xf4   : > { %2956 = vmatmul.mubr.msk.bf16.gmra.mrb[44].mxu1 %vm891_vm6, %v3719_v40  ;;  %v1474_v40 = vsel %vm955_vm2, %v1471_v3, %v1473_v59 }
  0xf5   : > { %2959 = vmatprep.mubr.msk.bf16.mxu1 %vm3377_vm3, %v3376_v57 }
  0xf8   : > { %3042 = vmatmul.mubr.msk.bf16.gmra.mrb[48].mxu0 %vm891_vm6, %v1472_v54  ;;  %v1452_v54 = vsel %vm680_vm4, %v3681_v52, %v1436_v48 }
  0xf9   : > { %3045 = vmatprep.mubr.msk.bf16.mxu0 %vm3377_vm3, %v3376_v57 }
  0xfc   : > { %2960 = vmatmul.mubr.msk.bf16.gmra.mrb[48].mxu1 %vm891_vm6, %v3730_v4  ;;  %v1476_v4 = vsel %vm955_vm2, %v1473_v59, %v1475_v60 }
  0xfd   : > { %2963 = vmatprep.mubr.msk.bf16.mxu1 %vm3377_vm3, %v3376_v57 }
 0x100   : > { %3046 = vmatmul.mubr.msk.bf16.gmra.mrb[52].mxu0 %vm891_vm6, %v1474_v40 }
 0x101   : > { %3049 = vmatprep.mubr.msk.bf16.mxu0 %vm3377_vm3, %v3376_v57 }
 0x104   : > { %2964 = vmatmul.mubr.msk.bf16.gmra.mrb[52].mxu1 %vm891_vm6, %v3764_v14  ;;  %v1478_v14 = vsel %vm955_vm2, %v1475_v60, %v1477_v5 }
 0x105   : > { %2967 = vmatprep.mubr.msk.bf16.mxu1 %vm3377_vm3, %v3376_v57 }
 0x108   : > { %3050 = vmatmul.mubr.msk.bf16.gmra.mrb[56].mxu0 %vm891_vm6, %v1476_v4  ;;  %v1438_v4 = vpop.permute.xlu0 %1437 }
 0x109   : > { %3053 = vmatprep.mubr.msk.bf16.mxu0 %vm3377_vm3, %v3376_v57 }
 0x10c   : > { %2968 = vmatmul.mubr.msk.bf16.gmra.mrb[56].mxu1 %vm891_vm6, %v3784_v12  ;;  %v1480_v12 = vsel %vm955_vm2, %v1477_v5, %v1479_v2  ;;  %v1506_v5 = vsel %vm955_vm2, %v1503_v34, %v1505_v51 }
 0x10d   : > { %2971 = vmatprep.mubr.msk.bf16.mxu1 %vm3377_vm3, %v3376_v57 }
 0x110   : > { %3054 = vmatmul.mubr.msk.bf16.gmra.mrb[60].mxu0 %vm891_vm6, %v1478_v14  ;;  %v1458_v14 = vsel %vm723_vm5, %v1452_v54, %v1446_v33 }
 0x111   : > { %3057 = vmatprep.mubr.msk.bf16.mxu0 %vm3377_vm3, %v3376_v57 }
 0x114   : > { %2972 = vmatmul.mubr.msk.bf16.gmra.mrb[60].mxu1 %vm891_vm6, %v3804_v36  ;;  %v1482_v36 = vsel %vm955_vm2, %v1479_v2, %v1481_v35 }
 0x115   : > { %2975 = vmatprep.mubr.msk.bf16.mxu1 %vm3377_vm3, %v3376_v57 }
 0x118   : > { %3058 = vmatmul.mubr.msk.bf16.gmra.mrb[64].mxu0 %vm891_vm6, %v1480_v12 }
 0x119   : > { %3061 = vmatprep.mubr.msk.bf16.mxu0 %vm3377_vm3, %v3376_v57 }
 0x11c   : > { %2976 = vmatmul.mubr.msk.bf16.gmra.mrb[64].mxu1 %vm891_vm6, %v3824_v50  ;;  %v1484_v50 = vsel %vm955_vm2, %v1481_v35, %v1483_v58  ;;  %v1507_v35 = vrot.slane %v1458_v14, 2 }
 0x11d   : > { %2979 = vmatprep.mubr.msk.bf16.mxu1 %vm3377_vm3, %v3376_v57 }
 0x120   : > { %3062 = vmatmul.mubr.msk.bf16.gmra.mrb[68].mxu0 %vm891_vm6, %v1482_v36 }
 0x121   : > { %3065 = vmatprep.mubr.msk.bf16.mxu0 %vm3377_vm3, %v3376_v57 }
 0x124   : > { %2980 = vmatmul.mubr.msk.bf16.gmra.mrb[68].mxu1 %vm891_vm6, %v3844_v17  ;;  %v1486_v17 = vsel %vm955_vm2, %v1483_v58, %v1485_v39 }
 0x125   : > { %2983 = vmatprep.mubr.msk.bf16.mxu1 %vm3377_vm3, %v3376_v57 }
 0x128   : > { %3066 = vmatmul.mubr.msk.bf16.gmra.mrb[72].mxu0 %vm891_vm6, %v1484_v50  ;;  %v1454_v50 = vsel %vm680_vm4, %v3702_v18, %v1438_v4 }
 0x129   : > { %3069 = vmatprep.mubr.msk.bf16.mxu0 %vm3377_vm3, %v3376_v57 }
 0x12c   : > { %2984 = vmatmul.mubr.msk.bf16.gmra.mrb[72].mxu1 %vm891_vm6, %v3864_v37  ;;  %v1488_v37 = vsel %vm955_vm2, %v1485_v39, %v1487_v0  ;;  %v1448_v39 = vpop.permute.xlu0 %1447 }
 0x12d   : > { %2987 = vmatprep.mubr.msk.bf16.mxu1 %vm3377_vm3, %v3376_v57 }
 0x130   : > { %3070 = vmatmul.mubr.msk.bf16.gmra.mrb[76].mxu0 %vm891_vm6, %v1486_v17 }
 0x131   : > { %3073 = vmatprep.mubr.msk.bf16.mxu0 %vm3377_vm3, %v3376_v57 }
 0x134   : > { %2988 = vmatmul.mubr.msk.bf16.gmra.mrb[76].mxu1 %vm891_vm6, %v3884_v56  ;;  %v1490_v56 = vsel %vm955_vm2, %v1487_v0, %v1489_v1 }
 0x135   : > { %2991 = vmatprep.mubr.msk.bf16.mxu1 %vm3377_vm3, %v3376_v57 }
 0x138   : > { %3074 = vmatmul.mubr.msk.bf16.gmra.mrb[80].mxu0 %vm891_vm6, %v1488_v37 }
 0x139   : > { %3077 = vmatprep.mubr.msk.bf16.mxu0 %vm3377_vm3, %v3376_v57 }
 0x13c   : > { %2992 = vmatmul.mubr.msk.bf16.gmra.mrb[80].mxu1 %vm891_vm6, %v3904_v13  ;;  %v1492_v13 = vsel %vm955_vm2, %v1489_v1, %v1491_v8  ;;  %v1508_v8 = vsel %vm955_vm2, %v1505_v51, %v1507_v35 }
 0x13d   : > { %2995 = vmatprep.mubr.msk.bf16.mxu1 %vm3377_vm3, %v3376_v57 }
 0x140   : > { %3078 = vmatmul.mubr.msk.bf16.gmra.mrb[84].mxu0 %vm891_vm6, %v1490_v56 }
 0x141   : > { %3081 = vmatprep.mubr.msk.bf16.mxu0 %vm3377_vm3, %v3376_v57 }
 0x144   : > { %2996 = vmatmul.mubr.msk.bf16.gmra.mrb[84].mxu1 %vm891_vm6, %v3921_v28 }
 0x145   : > { %2999 = vmatprep.mubr.msk.bf16.mxu1 %vm3377_vm3, %v3376_v57 }
 0x148   : > { %3082 = vmatmul.mubr.msk.bf16.gmra.mrb[88].mxu0 %vm891_vm6, %v1492_v13 }
 0x149   : > { %3085 = vmatprep.mubr.msk.bf16.mxu0 %vm3377_vm3, %v3376_v57 }
 0x14c   : > { %3000 = vmatmul.mubr.msk.bf16.gmra.mrb[88].mxu1 %vm891_vm6, %v3750_v63  ;;  %v1496_v63 = vsel %vm955_vm2, %v1493_v9, %v1495_v16 }
 0x14d   : > { %3003 = vmatprep.mubr.msk.bf16.mxu1 %vm3377_vm3, %v3376_v57 }
 0x150   : > { %3086 = vmatmul.mubr.msk.bf16.gmra.mrb[92].mxu0 %vm891_vm6, %v1494_v15 }
 0x151   : > { %3089 = vmatprep.mubr.msk.bf16.mxu0 %vm3377_vm3, %v3376_v57 }
 0x154   : > { %3004 = vmatmul.mubr.msk.bf16.gmra.mrb[92].mxu1 %vm891_vm6, %v3747_v62  ;;  %v1498_v62 = vsel %vm955_vm2, %v1495_v16, %v1497_v19 }
 0x155   : > { %3007 = vmatprep.mubr.msk.bf16.mxu1 %vm3377_vm3, %v3376_v57 }
 0x158   : > { %3090 = vmatmul.mubr.msk.bf16.gmra.mrb[96].mxu0 %vm891_vm6, %v1496_v63 }
 0x159   : > { %3093 = vmatprep.mubr.msk.bf16.mxu0 %vm3377_vm3, %v3376_v57 }
 0x15c   : > { %3008 = vmatmul.mubr.msk.bf16.gmra.mrb[96].mxu1 %vm891_vm6, %v3774_v61  ;;  %v1500_v61 = vsel %vm955_vm2, %v1497_v19, %v1499_v6 }
 0x15d   : > { %3011 = vmatprep.mubr.msk.bf16.mxu1 %vm3377_vm3, %v3376_v57 }
 0x160   : > { %3094 = vmatmul.mubr.msk.bf16.gmra.mrb[100].mxu0 %vm891_vm6, %v1498_v62 }
 0x161   : > { %3097 = vmatprep.mubr.msk.bf16.mxu0 %vm3377_vm3, %v3376_v57 }
 0x164   : > { %3012 = vmatmul.mubr.msk.bf16.gmra.mrb[100].mxu1 %vm891_vm6, %v3794_v24 }
 0x165   : > { %3015 = vmatprep.mubr.msk.bf16.mxu1 %vm3377_vm3, %v3376_v57 }
 0x168   : > { %3098 = vmatmul.mubr.msk.bf16.gmra.mrb[104].mxu0 %vm891_vm6, %v1500_v61 }
 0x169   : > { %3101 = vmatprep.mubr.msk.bf16.mxu0 %vm3377_vm3, %v3376_v57 }
 0x16b   : > { %v4092_v20 = vpop.f32.mrb[0].mxu0 }
 0x16c   : > { %v2867_v23 = vpop.f32.mrb[1].mxu0  ;;  %3016 = vmatmul.mubr.msk.bf16.gmra.mrb[104].mxu1 %vm891_vm6, %v3814_v49 }
 0x16d   : > { %v4096_v25 = vpop.f32.mrb[2].mxu0  ;;  %3019 = vmatprep.mubr.msk.bf16.mxu1 %vm3377_vm3, %v3376_v57 }
 0x16e   : > { %v2868_v24 = vpop.f32.mrb[3].mxu0 }
 0x16f   : > { %v4100_v26 = vpop.f32.mrb[0].mxu1 }
 0x170   : > { %v2911_v28 = vpop.f32.mrb[1].mxu1  ;;  %3102 = vmatmul.mubr.msk.bf16.gmra.mrb[108].mxu0 %vm891_vm6, %v1502_v27 }
 0x171   : > { %v4104_v29 = vpop.f32.mrb[2].mxu1  ;;  %3105 = vmatprep.mubr.msk.bf16.mxu0 %vm3377_vm3, %v3376_v57 }
 0x172   : > { %v2912_v49 = vpop.f32.mrb[3].mxu1 }
 0x173   : > { %v4109_v38 = vpop.f32.mrb[4].mxu0 }
 0x174   : > { %v2871_v41 = vpop.f32.mrb[5].mxu0  ;;  %3020 = vmatmul.mubr.msk.bf16.gmra.mrb[108].mxu1 %vm891_vm6, %v3834_v7 }
 0x175   : > { %v4115_v32 = vpop.f32.mrb[6].mxu0  ;;  %3023 = vmatprep.mubr.msk.bf16.mxu1 %vm3377_vm3, %v3376_v57 }
 0x176   : > { %v2872_v43 = vpop.f32.mrb[7].mxu0 }
 0x177   : > { %v4119_v11 = vpop.f32.mrb[4].mxu1 }
 0x178   : > { %v2915_v47 = vpop.f32.mrb[5].mxu1  ;;  %3106 = vmatmul.mubr.msk.bf16.gmra.mrb[112].mxu0 %vm891_vm6, %v1504_v10 }
 0x179   : > { %v4124_v7 = vpop.f32.mrb[6].mxu1  ;;  %3109 = vmatprep.mubr.msk.bf16.mxu0 %vm3377_vm3, %v3376_v57 }
 0x17a   : > { %v2916_v44 = vpop.f32.mrb[7].mxu1 }
 0x17b   : > { %v4128_v53 = vpop.f32.mrb[8].mxu0 }
 0x17c   : > { %v2875_v3 = vpop.f32.mrb[9].mxu0  ;;  %3024 = vmatmul.mubr.msk.bf16.gmra.mrb[112].mxu1 %vm891_vm6, %v3854_v22  ;;  %v593_v22 = vpop.permute.xlu1 %592 }
 0x17d   : > { %v4134_v59 = vpop.f32.mrb[10].mxu0  ;;  %3027 = vmatprep.mubr.msk.bf16.mxu1 %vm3377_vm3, %v3376_v57  ;;  %v722_v0 = vsel %vm680_vm4, %v3597_v21, %v593_v22 }
 0x17e   : > { %v2876_v40 = vpop.f32.mrb[11].mxu0 }
 0x17f   : > { %v4138_v60 = vpop.f32.mrb[8].mxu1 }
 0x180   : > { %v2919_v2 = vpop.f32.mrb[9].mxu1  ;;  %3110 = vmatmul.mubr.msk.bf16.gmra.mrb[116].mxu0 %vm891_vm6, %v1506_v5  ;;  %v679_v1 = vpop.permute.xlu1 %678 }
 0x181   : > { %v4143_v12 = vpop.f32.mrb[10].mxu1  ;;  %3113 = vmatprep.mubr.msk.bf16.mxu0 %vm3377_vm3, %v3376_v57  ;;  %v765_v9 = vsel %vm723_vm5, %v722_v0, %v679_v1 }
 0x182   : > { %v2920_v52 = vpop.f32.mrb[11].mxu1 }
 0x183   : > { %v4147_v36 = vpop.f32.mrb[12].mxu0 }
 0x184   : > { %v2879_v58 = vpop.f32.mrb[13].mxu0  ;;  %3028 = vmatmul.mubr.msk.bf16.gmra.mrb[116].mxu1 %vm891_vm6, %v3874_v45  ;;  %v1460_v45 = vsel %vm723_vm5, %v1454_v50, %v1448_v39 }
 0x185   : > { %v4153_v17 = vpop.f32.mrb[14].mxu0  ;;  %3031 = vmatprep.mubr.msk.bf16.mxu1 %vm3377_vm3, %v3376_v57  ;;  %v1509_v21 = vrot.slane %v1460_v45, 2 }
 0x186   : > { %v2880_v37 = vpop.f32.mrb[15].mxu0 }
 0x187   : > { %v4159_v56 = vpop.f32.mrb[12].mxu1  ;;  %v1510_v61 = vsel %vm955_vm2, %v1507_v35, %v1509_v21 }
 0x188   : > { %v2923_v13 = vpop.f32.mrb[13].mxu1  ;;  %3114 = vmatmul.mubr.msk.bf16.gmra.mrb[120].mxu0 %vm891_vm6, %v1508_v8 }
 0x189   : > { %v4164_v18 = vpop.f32.mrb[14].mxu1  ;;  %3117 = vmatprep.mubr.msk.bf16.mxu0 %vm3377_vm3, %v3376_v57 }
 0x18a   : > { %v2924_v15 = vpop.f32.mrb[15].mxu1 }
 0x18b   : > { %v4169_v16 = vpop.f32.mrb[16].mxu0 }
 0x18c   : > { %v2883_v63 = vpop.f32.mrb[17].mxu0  ;;  %3032 = vmatmul.mubr.msk.bf16.gmra.mrb[120].mxu1 %vm891_vm6, %v765_v9 }
 0x18d   : > { %v4172_v19 = vpop.f32.mrb[18].mxu0 }
 0x18e   : > { %v2884_v62 = vpop.f32.mrb[19].mxu0 }
 0x18f   : > { %v4174_v6 = vpop.f32.mrb[16].mxu1 }
 0x190   : > { %v2927_v31 = vpop.f32.mrb[17].mxu1  ;;  %3118 = vmatmul.mubr.msk.bf16.gmra.mrb[124].mxu0 %vm891_vm6, %v1510_v61 }
 0x191   : > { %v4178_v23 = vpop.f32.mrb[18].mxu1 }
 0x192   : > { %v2928_v57 = vpop.f32.mrb[19].mxu1 }
 0x193   : > { %v4180_v24 = vpop.f32.mrb[20].mxu0 }
 0x194   : > { %v2887_v27 = vpop.f32.mrb[21].mxu0 }
 0x195   : > { %v4182_v28 = vpop.f32.mrb[22].mxu0 }
 0x196   : > { %v2888_v30 = vpop.f32.mrb[23].mxu0 }
 0x197   : > { %v4184_v49 = vpop.f32.mrb[20].mxu1 }
 0x198   : > { %v2931_v34 = vpop.f32.mrb[21].mxu1 }
 0x199   : > { %v4186_v41 = vpop.f32.mrb[22].mxu1 }
 0x19a   : > { %v2932_v55 = vpop.f32.mrb[23].mxu1 }
 0x19b   : > { %v4188_v42 = vpop.f32.mrb[24].mxu0 }
 0x19c   : > { %v2891_v43 = vpop.f32.mrb[25].mxu0 }
 0x19d   : > { %v4190_v10 = vpop.f32.mrb[26].mxu0 }
 0x19e   : > { %v2892_v46 = vpop.f32.mrb[27].mxu0 }
 0x19f   : > { %v4192_v47 = vpop.f32.mrb[24].mxu1 }
 0x1a0   : > { %v2935_v48 = vpop.f32.mrb[25].mxu1 }
 0x1a1   : > { %v4194_v44 = vpop.f32.mrb[26].mxu1 }
 0x1a2   : > { %v2936_v51 = vpop.f32.mrb[27].mxu1 }
 0x1a3   : > { %v4196_v33 = vpop.f32.mrb[28].mxu0  ;;  %v4229_v51 = vld [vmem:[%s4529_s2] ss:$0 sm:$0xff] }
 0x1a4   : > { %v2895_v3 = vpop.f32.mrb[29].mxu0 }
 0x1a5   : > { %v4198_v54 = vpop.f32.mrb[30].mxu0 }
 0x1a6   : > { %v2896_v40 = vpop.f32.mrb[31].mxu0 }
 0x1a7   : > { %v4200_v4 = vpop.f32.mrb[28].mxu1 }
 0x1a8   : > { %v2939_v5 = vpop.f32.mrb[29].mxu1 }
 0x1a9   : > { %v4202_v14 = vpop.f32.mrb[30].mxu1 }
 0x1aa   : > { %v2940_v2 = vpop.f32.mrb[31].mxu1 }
 0x1ab   : > { %v4204_v22 = vpop.f32.mrb[32].mxu0 }
 0x1ac   : > { %v2899_v52 = vpop.f32.mrb[33].mxu0 }
 0x1ad   : > { %v4206_v35 = vpop.f32.mrb[34].mxu0 }
 0x1ae   : > { %v2900_v58 = vpop.f32.mrb[35].mxu0 }
 0x1af   : > { %v4208_v50 = vpop.f32.mrb[32].mxu1 }
 0x1b0   : > { %v2943_v39 = vpop.f32.mrb[33].mxu1 }
 0x1b1   : > { %v4210_v0 = vpop.f32.mrb[34].mxu1 }
 0x1b2   : > { %v2944_v37 = vpop.f32.mrb[35].mxu1 }
 0x1b3   : > { %v4212_v1 = vpop.f32.mrb[36].mxu0 }
 0x1b4   : > { %v2903_v8 = vpop.f32.mrb[37].mxu0 }
 0x1b5   : > { %v4214_v45 = vpop.f32.mrb[38].mxu0 }
 0x1b6   : > { %v2904_v13 = vpop.f32.mrb[39].mxu0 }
 0x1b7   : > { %v4216_v9 = vpop.f32.mrb[36].mxu1 }
 0x1b8   : > { %v2947_v15 = vpop.f32.mrb[37].mxu1 }
 0x1b9   : > { %v4218_v21 = vpop.f32.mrb[38].mxu1 }
 0x1ba   : > { %v2948_v63 = vpop.f32.mrb[39].mxu1 }
 0x1bb   : > { %v4220_v62 = vpop.f32.mrb[40].mxu0 }
 0x1bc   : > { %v2907_v61 = vpop.f32.mrb[41].mxu0 }
 0x1bd   : > { %v4222_v31 = vpop.f32.mrb[42].mxu0 }
 0x1be   : > { %v2908_v57 = vpop.f32.mrb[43].mxu0 }
 0x1bf   : > { %v1244_v27 = vpop.f32.mrb[40].mxu1 }
 0x1c0   : > { %v1245_v30 = vadd.f32 %v1244_v27, %v4092_v20  ;;  %v2953_v34 = vpop.f32.mrb[41].mxu1 }
 0x1c1   : > { %v1247_v55 = vpop.f32.mrb[42].mxu1 }
 0x1c2   : > { %v1248_v43 = vadd.f32 %v1247_v55, %v4096_v25  ;;  %v2954_v46 = vpop.f32.mrb[43].mxu1 }
 0x1c3   : > { %v1616_v48 = vpop.f32.mrb[44].mxu0 }
 0x1c4   : > { %v1783_v3 = vadd.f32 %v1616_v48, %v1245_v30  ;;  %v3039_v40 = vpop.f32.mrb[45].mxu0 }
 0x1c5   : > { %v1619_v5 = vpop.f32.mrb[46].mxu0 }
 0x1c6   : > { %v4232_v2 = vadd.f32 %v4229_v51, %v1783_v3  ;;  %v1784_v52 = vadd.f32 %v1619_v5, %v1248_v43  ;;  %v3040_v58 = vpop.f32.mrb[47].mxu0 }
 0x1c7   : > { %v1252_v20 = vpop.f32.mrb[44].mxu1 }
 0x1c8   : > { %v1874_v39 = vsub.f32 0.0, %v4232_v2  ;;  %v4236_v25 = vadd.f32 %v4229_v51, %v1784_v52  ;;  %v1253_v37 = vadd.f32 %v1252_v20, %v4109_v38  ;;  %v2957_v8 = vpop.f32.mrb[45].mxu1 }
 0x1c9   : > { %v1255_v13 = vpop.f32.mrb[46].mxu1 }
 0x1ca   : > { %v1916_v15 = vmin.f32 %v1874_v39, 80.0  ;;  %v1875_v63 = vsub.f32 0.0, %v4236_v25  ;;  %v1256_v61 = vadd.f32 %v1255_v13, %v4115_v32  ;;  %v2958_v57 = vpop.f32.mrb[47].mxu1 }
 0x1cb   : > { %v1624_v27 = vpop.f32.mrb[48].mxu0 }
 0x1cc   : > { %v1958_v30 = vmul.f32 1.442695, %v1916_v15  ;;  %v1917_v34 = vmin.f32 %v1875_v63, 80.0  ;;  %v1785_v55 = vadd.f32 %v1624_v27, %v1253_v37  ;;  %v3043_v43 = vpop.f32.mrb[49].mxu0 }
 0x1cd   : > { %v1627_v46 = vpop.f32.mrb[50].mxu0 }
 0x1ce   : > { %3181 = vpow2.f32 %v1958_v30  ;;  %v1960_v48 = vmul.f32 1.442695, %v1917_v34  ;;  %v4242_v3 = vadd.f32 %v4229_v51, %v1785_v55  ;;  %v1786_v38 = vadd.f32 %v1627_v46, %v1256_v61  ;;  %v3044_v40 = vpop.f32.mrb[51].mxu0 }
 0x1cf   : > { %v1260_v5 = vpop.f32.mrb[48].mxu1 }
 0x1d0   : > { %3183 = vpow2.f32 %v1960_v48  ;;  %v1876_v52 = vsub.f32 0.0, %v4242_v3  ;;  %v4246_v32 = vadd.f32 %v4229_v51, %v1786_v38  ;;  %v1261_v58 = vadd.f32 %v1260_v5, %v4128_v53  ;;  %v2961_v20 = vpop.f32.mrb[49].mxu1 }
 0x1d1   : > { %v1263_v39 = vpop.f32.mrb[50].mxu1 }
 0x1d2   : > { %v1918_v37 = vmin.f32 %v1876_v52, 80.0  ;;  %v1877_v8 = vsub.f32 0.0, %v4246_v32  ;;  %v1264_v13 = vadd.f32 %v1263_v39, %v4134_v59  ;;  %v2962_v15 = vpop.f32.mrb[51].mxu1 }
 0x1d3   : > { %v1632_v63 = vpop.f32.mrb[52].mxu0 }
 0x1d4   : > { %v1962_v61 = vmul.f32 1.442695, %v1918_v37  ;;  %v1919_v57 = vmin.f32 %v1877_v8, 80.0  ;;  %v1787_v27 = vadd.f32 %v1632_v63, %v1261_v58  ;;  %v3047_v30 = vpop.f32.mrb[53].mxu0 }
 0x1d5   : > { %v1635_v34 = vpop.f32.mrb[54].mxu0 }
 0x1d6   : > { %3185 = vpow2.f32 %v1962_v61  ;;  %v1964_v55 = vmul.f32 1.442695, %v1919_v57  ;;  %v4252_v43 = vadd.f32 %v4229_v51, %v1787_v27  ;;  %v1788_v53 = vadd.f32 %v1635_v34, %v1264_v13  ;;  %v3048_v46 = vpop.f32.mrb[55].mxu0 }
 0x1d7   : > { %v1268_v48 = vpop.f32.mrb[52].mxu1 }
 0x1d8   : > { %v3182_v38 = vpop.eup %3181  ;;  %3187 = vpow2.f32 %v1964_v55  ;;  %v1878_v59 = vsub.f32 0.0, %v4252_v43  ;;  %v4256_v40 = vadd.f32 %v4229_v51, %v1788_v53  ;;  %v1269_v5 = vadd.f32 %v1268_v48, %v4147_v36  ;;  %v2965_v52 = vpop.f32.mrb[53].mxu1 }
 0x1d9   : > { %v2042_v58 = vadd.f32 1.0, %v3182_v38  ;;  %v1271_v20 = vpop.f32.mrb[54].mxu1 }
 0x1da   : > { %v3184_v39 = vpop.eup %3183  ;;  %v1920_v37 = vmin.f32 %v1878_v59, 80.0  ;;  %v1879_v8 = vsub.f32 0.0, %v4256_v40  ;;  %v1272_v13 = vadd.f32 %v1271_v20, %v4153_v17  ;;  %v2966_v15 = vpop.f32.mrb[55].mxu1 }
 0x1db   : > { %3189 = vrcp.f32 %v2042_v58  ;;  %v2043_v63 = vadd.f32 1.0, %v3184_v39  ;;  %v1640_v61 = vpop.f32.mrb[56].mxu0 }
 0x1dc   : > { %v1966_v57 = vmul.f32 1.442695, %v1920_v37  ;;  %v1921_v27 = vmin.f32 %v1879_v8, 80.0  ;;  %v1789_v30 = vadd.f32 %v1640_v61, %v1269_v5  ;;  %v3051_v34 = vpop.f32.mrb[57].mxu0 }
 0x1dd   : > { %3191 = vrcp.f32 %v2043_v63  ;;  %v1643_v36 = vpop.f32.mrb[58].mxu0 }
 0x1de   : > { %3193 = vpow2.f32 %v1966_v57  ;;  %v1968_v55 = vmul.f32 1.442695, %v1921_v27  ;;  %v4269_v17 = vadd.f32 %v4229_v51, %v1789_v30  ;;  %v1790_v53 = vadd.f32 %v1643_v36, %v1272_v13  ;;  %v3052_v46 = vpop.f32.mrb[59].mxu0 }
 0x1df   : > { %v1276_v48 = vpop.f32.mrb[56].mxu1 }
 0x1e0   : > { %v3186_v38 = vpop.eup %3185  ;;  %3195 = vpow2.f32 %v1968_v55  ;;  %v1880_v59 = vsub.f32 0.0, %v4269_v17  ;;  %v4273_v5 = vadd.f32 %v4229_v51, %v1790_v53  ;;  %v1277_v52 = vadd.f32 %v1276_v48, %v4169_v16  ;;  %v2969_v58 = vpop.f32.mrb[57].mxu1 }
 0x1e1   : > { %v2044_v20 = vadd.f32 1.0, %v3186_v38  ;;  %v1279_v39 = vpop.f32.mrb[58].mxu1 }
 0x1e2   : > { %v3188_v37 = vpop.eup %3187  ;;  %v1922_v8 = vmin.f32 %v1880_v59, 80.0  ;;  %v1881_v13 = vsub.f32 0.0, %v4273_v5  ;;  %v1280_v15 = vadd.f32 %v1279_v39, %v4172_v19  ;;  %v2970_v63 = vpop.f32.mrb[59].mxu1 }
 0x1e3   : > { %3197 = vrcp.f32 %v2044_v20  ;;  %v2045_v61 = vadd.f32 1.0, %v3188_v37  ;;  %v1648_v57 = vpop.f32.mrb[60].mxu0 }
 0x1e4   : > { %v1970_v27 = vmul.f32 1.442695, %v1922_v8  ;;  %v1923_v16 = vmin.f32 %v1881_v13, 80.0  ;;  %v1791_v30 = vadd.f32 %v1648_v57, %v1277_v52  ;;  %v3055_v34 = vpop.f32.mrb[61].mxu0 }
 0x1e5   : > { %v3190_v36 = vpop.eup %3189  ;;  %3199 = vrcp.f32 %v2045_v61  ;;  %v1651_v55 = vpop.f32.mrb[62].mxu0 }
 0x1e6   : > { %3201 = vpow2.f32 %v1970_v27  ;;  %v1972_v53 = vmul.f32 1.442695, %v1923_v16  ;;  %v4286_v46 = vadd.f32 %v4229_v51, %v1791_v30  ;;  %v3056_v48 = vpop.f32.mrb[63].mxu0  ;;  %v2126_v19 = vmul.f32 %v3190_v36, %v4232_v2 }
 0x1e7   : > { %v3192_v38 = vpop.eup %3191  ;;  %v1792_v59 = vadd.f32 %v1651_v55, %v1280_v15  ;;  %v1284_v58 = vpop.f32.mrb[60].mxu1 }
 0x1e8   : > { %v3194_v20 = vpop.eup %3193  ;;  %v2127_v39 = vmul.f32 %v3192_v38, %v4236_v25  ;;  %3203 = vpow2.f32 %v1972_v53  ;;  %v1882_v52 = vsub.f32 0.0, %v4286_v46  ;;  %v1285_v37 = vadd.f32 %v1284_v58, %v4180_v24  ;;  %v2973_v8 = vpop.f32.mrb[61].mxu1 }
 0x1e9   : > { %v2046_v13 = vadd.f32 1.0, %v3194_v20  ;;  %v4298_v2 = vadd.f32 %v4229_v51, %v1792_v59  ;;  %v1287_v15 = vpop.f32.mrb[62].mxu1 }
 0x1ea   : > { %v3196_v63 = vpop.eup %3195  ;;  %v2675_v61 = vpack.c.bf16 %v2127_v39, %v2126_v19  ;;  %v1924_v25 = vmin.f32 %v1882_v52, 80.0  ;;  %v1288_v57 = vadd.f32 %v1287_v15, %v4182_v28  ;;  %v2974_v27 = vpop.f32.mrb[63].mxu1 }
 0x1eb   : > { %3205 = vrcp.f32 %v2046_v13  ;;  %v2047_v24 = vadd.f32 1.0, %v3196_v63  ;;  %v1883_v16 = vsub.f32 0.0, %v4298_v2  ;;  %v1656_v30 = vpop.f32.mrb[64].mxu0 }
 0x1ec   : > { %2676 = vst [vmem:[%s4295_s9] sm:$0xff] %v2675_v61   ;;  %v1974_v34 = vmul.f32 1.442695, %v1924_v25  ;;  %v1793_v36 = vadd.f32 %v1656_v30, %v1285_v37  ;;  %v3059_v55 = vpop.f32.mrb[65].mxu0 }
 0x1ed   : > { %v3198_v53 = vpop.eup %3197  ;;  %3207 = vrcp.f32 %v2047_v24  ;;  %v1925_v48 = vmin.f32 %v1883_v16, 80.0  ;;  %v1659_v38 = vpop.f32.mrb[66].mxu0 }
 0x1ee   : > { %3209 = vpow2.f32 %v1974_v34  ;;  %v4304_v19 = vadd.f32 %v4229_v51, %v1793_v36  ;;  %v1794_v59 = vadd.f32 %v1659_v38, %v1288_v57  ;;  %v3060_v28 = vpop.f32.mrb[67].mxu0  ;;  %v2128_v20 = vmul.f32 %v3198_v53, %v4242_v3 }
 0x1ef   : > { %v3200_v58 = vpop.eup %3199  ;;  %v1976_v39 = vmul.f32 1.442695, %v1925_v48  ;;  %v1292_v52 = vpop.f32.mrb[64].mxu1 }
 0x1f0   : > { %v3202_v8 = vpop.eup %3201  ;;  %v2129_v13 = vmul.f32 %v3200_v58, %v4246_v32  ;;  %v1884_v37 = vsub.f32 0.0, %v4304_v19  ;;  %v4310_v15 = vadd.f32 %v4229_v51, %v1794_v59  ;;  %v1293_v63 = vadd.f32 %v1292_v52, %v4188_v42  ;;  %v2977_v61 = vpop.f32.mrb[65].mxu1 }
 0x1f1   : > { %v2048_v25 = vadd.f32 1.0, %v3202_v8  ;;  %3211 = vpow2.f32 %v1976_v39  ;;  %v1295_v57 = vpop.f32.mrb[66].mxu1 }
 0x1f2   : > { %v3204_v27 = vpop.eup %3203  ;;  %v2680_v24 = vpack.c.bf16 %v2129_v13, %v2128_v20  ;;  %v1926_v3 = vmin.f32 %v1884_v37, 80.0  ;;  %v1885_v16 = vsub.f32 0.0, %v4310_v15  ;;  %v1296_v30 = vadd.f32 %v1295_v57, %v4190_v10  ;;  %v2978_v32 = vpop.f32.mrb[67].mxu1 }
 0x1f3   : > { %3213 = vrcp.f32 %v2048_v25  ;;  %v2049_v34 = vadd.f32 1.0, %v3204_v27  ;;  %v1664_v36 = vpop.f32.mrb[68].mxu0 }
 0x1f4   : > { %2777 = vst [vmem:[%s4295_s9 + $0x8] sm:$0xff] %v2680_v24   ;;  %v1978_v55 = vmul.f32 1.442695, %v1926_v3  ;;  %v1927_v53 = vmin.f32 %v1885_v16, 80.0  ;;  %v1795_v48 = vadd.f32 %v1664_v36, %v1293_v63  ;;  %v3063_v42 = vpop.f32.mrb[69].mxu0 }
 0x1f5   : > { %v3206_v38 = vpop.eup %3205  ;;  %3215 = vrcp.f32 %v2049_v34  ;;  %v1667_v59 = vpop.f32.mrb[70].mxu0 }
 0x1f6   : > { %3217 = vpow2.f32 %v1978_v55  ;;  %v1980_v28 = vmul.f32 1.442695, %v1927_v53  ;;  %v4317_v58 = vadd.f32 %v4229_v51, %v1795_v48  ;;  %v3064_v20 = vpop.f32.mrb[71].mxu0  ;;  %v2130_v10 = vmul.f32 %v3206_v38, %v4252_v43 }
 0x1f7   : > { %v3208_v39 = vpop.eup %3207  ;;  %v1796_v52 = vadd.f32 %v1667_v59, %v1296_v30  ;;  %v1300_v8 = vpop.f32.mrb[68].mxu1 }
 0x1f8   : > { %v3210_v13 = vpop.eup %3209  ;;  %v2131_v37 = vmul.f32 %v3208_v39, %v4256_v40  ;;  %3219 = vpow2.f32 %v1980_v28  ;;  %v1886_v63 = vsub.f32 0.0, %v4317_v58  ;;  %v1301_v61 = vadd.f32 %v1300_v8, %v4196_v33  ;;  %v2981_v25 = vpop.f32.mrb[69].mxu1 }
 0x1f9   : > { %v2050_v57 = vadd.f32 1.0, %v3210_v13  ;;  %v4324_v27 = vadd.f32 %v4229_v51, %v1796_v52  ;;  %v1303_v24 = vpop.f32.mrb[70].mxu1 }
 0x1fa   : > { %v2685_v3 = vpack.c.bf16 %v2131_v37, %v2130_v10  ;;  %v1928_v16 = vmin.f32 %v1886_v63, 80.0  ;;  %v1304_v43 = vadd.f32 %v1303_v24, %v4198_v54  ;;  %v2982_v30 = vpop.f32.mrb[71].mxu1 }
 0x1fb   : > { %v3212_v32 = vpop.eup %3211  ;;  %v1887_v34 = vsub.f32 0.0, %v4324_v27  ;;  %v1672_v40 = vpop.f32.mrb[72].mxu0  ;;  %3221 = vrcp.f32 %v2050_v57 }
 0x1fc   : > { %2778 = vst [vmem:[%s4295_s9 + $0x10] sm:$0xff] %v2685_v3   ;;  %v2051_v36 = vadd.f32 1.0, %v3212_v32  ;;  %v1982_v55 = vmul.f32 1.442695, %v1928_v16  ;;  %v1797_v33 = vadd.f32 %v1672_v40, %v1301_v61  ;;  %v3067_v53 = vpop.f32.mrb[73].mxu0 }
 0x1fd   : > { %v3214_v48 = vpop.eup %3213  ;;  %v1929_v42 = vmin.f32 %v1887_v34, 80.0  ;;  %v1675_v38 = vpop.f32.mrb[74].mxu0 }
 0x1fe   : > { %3223 = vrcp.f32 %v2051_v36  ;;  %v4330_v59 = vadd.f32 %v4229_v51, %v1797_v33  ;;  %v1798_v28 = vadd.f32 %v1675_v38, %v1304_v43  ;;  %v3068_v54 = vpop.f32.mrb[75].mxu0  ;;  %v2132_v39 = vmul.f32 %v3214_v48, %v4269_v17 }
 0x1ff   : > { %v3216_v20 = vpop.eup %3215  ;;  %3225 = vpow2.f32 %v1982_v55  ;;  %v1984_v10 = vmul.f32 1.442695, %v1929_v42  ;;  %v1308_v52 = vpop.f32.mrb[72].mxu1 }
 0x200   : > { %v3218_v8 = vpop.eup %3217  ;;  %v2133_v13 = vmul.f32 %v3216_v20, %v4273_v5  ;;  %v1888_v37 = vsub.f32 0.0, %v4330_v59  ;;  %v4336_v63 = vadd.f32 %v4229_v51, %v1798_v28  ;;  %v1309_v61 = vadd.f32 %v1308_v52, %v4204_v22  ;;  %v2985_v25 = vpop.f32.mrb[73].mxu1 }
 0x201   : > { %v2052_v57 = vadd.f32 1.0, %v3218_v8  ;;  %3227 = vpow2.f32 %v1984_v10  ;;  %v1311_v24 = vpop.f32.mrb[74].mxu1 }
 0x202   : > { %v3220_v3 = vpop.eup %3219  ;;  %v2690_v17 = vpack.c.bf16 %v2133_v13, %v2132_v39  ;;  %v1930_v16 = vmin.f32 %v1888_v37, 80.0  ;;  %v1889_v43 = vsub.f32 0.0, %v4336_v63  ;;  %v1312_v30 = vadd.f32 %v1311_v24, %v4206_v35  ;;  %v2986_v5 = vpop.f32.mrb[75].mxu1 }
 0x203   : > { %3229 = vrcp.f32 %v2052_v57  ;;  %v2053_v32 = vadd.f32 1.0, %v3220_v3  ;;  %v1680_v34 = vpop.f32.mrb[76].mxu0 }
 0x204   : > { %2779 = vst [vmem:[%s4295_s9 + $0x18] sm:$0xff] %v2690_v17   ;;  %v1986_v40 = vmul.f32 1.442695, %v1930_v16  ;;  %v1931_v36 = vmin.f32 %v1889_v43, 80.0  ;;  %v1799_v55 = vadd.f32 %v1680_v34, %v1309_v61  ;;  %v3071_v22 = vpop.f32.mrb[77].mxu0 }
 0x205   : > { %3231 = vrcp.f32 %v2053_v32  ;;  %v1683_v33 = vpop.f32.mrb[78].mxu0  ;;  %v3222_v53 = vpop.eup %3221 }
 0x206   : > { %3233 = vpow2.f32 %v1986_v40  ;;  %v1988_v48 = vmul.f32 1.442695, %v1931_v36  ;;  %v4343_v42 = vadd.f32 %v4229_v51, %v1799_v55  ;;  %v3072_v38 = vpop.f32.mrb[79].mxu0  ;;  %v1800_v28 = vadd.f32 %v1683_v33, %v1312_v30 }
 0x207   : > { %v1316_v35 = vpop.f32.mrb[76].mxu1  ;;  %v2134_v8 = vmul.f32 %v3222_v53, %v4286_v46 }
 0x208   : > { %v3224_v54 = vpop.eup %3223  ;;  %3235 = vpow2.f32 %v1988_v48  ;;  %v1890_v20 = vsub.f32 0.0, %v4343_v42  ;;  %v1317_v39 = vadd.f32 %v1316_v35, %v4212_v1  ;;  %v2989_v10 = vpop.f32.mrb[77].mxu1  ;;  %v4350_v37 = vadd.f32 %v4229_v51, %v1800_v28 }
 0x209   : > { %v3226_v52 = vpop.eup %3225  ;;  %v2135_v13 = vmul.f32 %v3224_v54, %v4298_v2  ;;  %v1319_v61 = vpop.f32.mrb[78].mxu1 }
 0x20a   : > { %v2054_v25 = vadd.f32 1.0, %v3226_v52  ;;  %v1932_v57 = vmin.f32 %v1890_v20, 80.0  ;;  %v1320_v24 = vadd.f32 %v1319_v61, %v4214_v45  ;;  %v2990_v3 = vpop.f32.mrb[79].mxu1  ;;  %v1891_v1 = vsub.f32 0.0, %v4350_v37 }
 0x20b   : > { %v3228_v17 = vpop.eup %3227  ;;  %v2695_v16 = vpack.c.bf16 %v2135_v13, %v2134_v8  ;;  %v1688_v43 = vpop.f32.mrb[80].mxu0 }
 0x20c   : > { %3237 = vrcp.f32 %v2054_v25  ;;  %v2055_v30 = vadd.f32 1.0, %v3228_v17  ;;  %v1990_v46 = vmul.f32 1.442695, %v1932_v57  ;;  %v1801_v5 = vadd.f32 %v1688_v43, %v1317_v39  ;;  %v3075_v2 = vpop.f32.mrb[81].mxu0 }
 0x20d   : > { %v3230_v32 = vpop.eup %3229  ;;  %2780 = vst [vmem:[%s4295_s9 + $0x20] sm:$0xff] %v2695_v16   ;;  %v1933_v34 = vmin.f32 %v1891_v1, 80.0  ;;  %v1691_v40 = vpop.f32.mrb[82].mxu0 }
 0x20e   : > { %3239 = vrcp.f32 %v2055_v30  ;;  %v4356_v36 = vadd.f32 %v4229_v51, %v1801_v5  ;;  %v1802_v45 = vadd.f32 %v1691_v40, %v1320_v24  ;;  %v3076_v55 = vpop.f32.mrb[83].mxu0  ;;  %v2136_v33 = vmul.f32 %v3230_v32, %v4304_v19 }
 0x20f   : > { %v3232_v22 = vpop.eup %3231  ;;  %3241 = vpow2.f32 %v1990_v46  ;;  %v1992_v53 = vmul.f32 1.442695, %v1933_v34  ;;  %v1324_v48 = vpop.f32.mrb[80].mxu1 }
 0x210   : > { %v3234_v38 = vpop.eup %3233  ;;  %v2137_v28 = vmul.f32 %v3232_v22, %v4310_v15  ;;  %v1892_v35 = vsub.f32 0.0, %v4356_v36  ;;  %v4362_v54 = vadd.f32 %v4229_v51, %v1802_v45  ;;  %v1325_v20 = vadd.f32 %v1324_v48, %v4220_v62  ;;  %v2993_v39 = vpop.f32.mrb[81].mxu1 }
 0x211   : > { %v2056_v10 = vadd.f32 1.0, %v3234_v38  ;;  %3243 = vpow2.f32 %v1992_v53  ;;  %v1327_v52 = vpop.f32.mrb[82].mxu1 }
 0x212   : > { %v3236_v8 = vpop.eup %3235  ;;  %v2700_v19 = vpack.c.bf16 %v2137_v28, %v2136_v33  ;;  %v1934_v13 = vmin.f32 %v1892_v35, 80.0  ;;  %v1893_v61 = vsub.f32 0.0, %v4362_v54  ;;  %v1328_v25 = vadd.f32 %v1327_v52, %v4222_v31  ;;  %v2994_v15 = vpop.f32.mrb[83].mxu1 }
 0x213   : > { %3245 = vrcp.f32 %v2056_v10  ;;  %v2057_v57 = vadd.f32 1.0, %v3236_v8  ;;  %v1696_v24 = vpop.f32.mrb[84].mxu0 }
 0x214   : > { %2781 = vst [vmem:[%s4295_s9 + $0x28] sm:$0xff] %v2700_v19   ;;  %v1994_v3 = vmul.f32 1.442695, %v1934_v13  ;;  %v1935_v17 = vmin.f32 %v1893_v61, 80.0  ;;  %v1803_v16 = vadd.f32 %v1696_v24, %v1325_v20  ;;  %v3079_v62 = vpop.f32.mrb[85].mxu0 }
 0x215   : > { %3247 = vrcp.f32 %v2057_v57  ;;  %v1699_v1 = vpop.f32.mrb[86].mxu0 }
 0x216   : > { %v3238_v43 = vpop.eup %3237  ;;  %3249 = vpow2.f32 %v1994_v3  ;;  %v1996_v30 = vmul.f32 1.442695, %v1935_v17  ;;  %v4369_v46 = vadd.f32 %v4229_v51, %v1803_v16  ;;  %v1804_v5 = vadd.f32 %v1699_v1, %v1328_v25  ;;  %v3080_v2 = vpop.f32.mrb[87].mxu0 }
 0x217   : > { %v1332_v31 = vpop.f32.mrb[84].mxu1  ;;  %v2138_v33 = vmul.f32 %v3238_v43, %v4317_v58 }
 0x218   : > { %v3240_v32 = vpop.eup %3239  ;;  %3251 = vpow2.f32 %v1996_v30  ;;  %v1894_v34 = vsub.f32 0.0, %v4369_v46  ;;  %v4373_v40 = vadd.f32 %v4229_v51, %v1804_v5  ;;  %v1333_v45 = vadd.f32 %v1332_v31, %v4100_v26  ;;  %v2997_v55 = vpop.f32.mrb[85].mxu1 }
 0x219   : > { %v3242_v22 = vpop.eup %3241  ;;  %v2139_v53 = vmul.f32 %v3240_v32, %v4324_v27  ;;  %v1335_v48 = vpop.f32.mrb[86].mxu1 }
 0x21a   : > { %v2058_v38 = vadd.f32 1.0, %v3242_v22  ;;  %v1936_v28 = vmin.f32 %v1894_v34, 80.0  ;;  %v1895_v35 = vsub.f32 0.0, %v4373_v40  ;;  %v1336_v20 = vadd.f32 %v1335_v48, %v4104_v29  ;;  %v2998_v39 = vpop.f32.mrb[87].mxu1 }
 0x21b   : > { %v3244_v10 = vpop.eup %3243  ;;  %v2705_v52 = vpack.c.bf16 %v2139_v53, %v2138_v33  ;;  %v1704_v8 = vpop.f32.mrb[88].mxu0 }
 0x21c   : > { %3253 = vrcp.f32 %v2058_v38  ;;  %v2059_v26 = vadd.f32 1.0, %v3244_v10  ;;  %v1998_v19 = vmul.f32 1.442695, %v1936_v28  ;;  %v1937_v13 = vmin.f32 %v1895_v35, 80.0  ;;  %v3083_v61 = vpop.f32.mrb[89].mxu0 }
 0x21d   : > { %v3246_v58 = vpop.eup %3245  ;;  %2782 = vst [vmem:[%s4295_s9 + $0x30] sm:$0xff] %v2705_v52   ;;  %v1805_v27 = vadd.f32 %v1704_v8, %v1333_v45  ;;  %v1707_v25 = vpop.f32.mrb[90].mxu0 }
 0x21e   : > { %3255 = vrcp.f32 %v2059_v26  ;;  %v2000_v15 = vmul.f32 1.442695, %v1937_v13  ;;  %v1806_v57 = vadd.f32 %v1707_v25, %v1336_v20  ;;  %v3084_v24 = vpop.f32.mrb[91].mxu0  ;;  %v2140_v29 = vmul.f32 %v3246_v58, %v4330_v59 }
 0x21f   : > { %v3248_v3 = vpop.eup %3247  ;;  %3257 = vpow2.f32 %v1998_v19  ;;  %v4383_v17 = vadd.f32 %v4229_v51, %v1805_v27  ;;  %v1340_v16 = vpop.f32.mrb[88].mxu1 }
 0x220   : > { %v3250_v62 = vpop.eup %3249  ;;  %v2141_v1 = vmul.f32 %v3248_v3, %v4336_v63  ;;  %3259 = vpow2.f32 %v2000_v15  ;;  %v4387_v43 = vadd.f32 %v4229_v51, %v1806_v57  ;;  %v1341_v30 = vadd.f32 %v1340_v16, %v4119_v11  ;;  %v3001_v5 = vpop.f32.mrb[89].mxu1 }
 0x221   : > { %v2060_v2 = vadd.f32 1.0, %v3250_v62  ;;  %v1896_v31 = vsub.f32 0.0, %v4383_v17  ;;  %v1343_v59 = vpop.f32.mrb[90].mxu1 }
 0x222   : > { %v3252_v32 = vpop.eup %3251  ;;  %v2710_v34 = vpack.c.bf16 %v2141_v1, %v2140_v29  ;;  %v1897_v45 = vsub.f32 0.0, %v4387_v43  ;;  %v1344_v55 = vadd.f32 %v1343_v59, %v4124_v7  ;;  %v3002_v22 = vpop.f32.mrb[91].mxu1 }
 0x223   : > { %3261 = vrcp.f32 %v2060_v2  ;;  %v2061_v63 = vadd.f32 1.0, %v3252_v32  ;;  %v1938_v33 = vmin.f32 %v1896_v31, 80.0  ;;  %v1712_v53 = vpop.f32.mrb[92].mxu0 }
 0x224   : > { %2783 = vst [vmem:[%s4295_s9 + $0x38] sm:$0xff] %v2710_v34   ;;  %v1939_v48 = vmin.f32 %v1897_v45, 80.0  ;;  %v1807_v38 = vadd.f32 %v1712_v53, %v1341_v30  ;;  %v3087_v11 = vpop.f32.mrb[93].mxu0 }
 0x225   : > { %3263 = vrcp.f32 %v2061_v63  ;;  %v2002_v28 = vmul.f32 1.442695, %v1938_v33  ;;  %v1715_v35 = vpop.f32.mrb[94].mxu0 }
 0x226   : > { %v3254_v20 = vpop.eup %3253  ;;  %v2004_v39 = vmul.f32 1.442695, %v1939_v48  ;;  %v4395_v10 = vadd.f32 %v4229_v51, %v1807_v38  ;;  %v1808_v52 = vadd.f32 %v1715_v35, %v1344_v55  ;;  %v3088_v8 = vpop.f32.mrb[95].mxu0 }
 0x227   : > { %3265 = vpow2.f32 %v2002_v28  ;;  %v1348_v7 = vpop.f32.mrb[92].mxu1  ;;  %v2142_v25 = vmul.f32 %v3254_v20, %v4343_v42 }
 0x228   : > { %v3256_v26 = vpop.eup %3255  ;;  %3267 = vpow2.f32 %v2004_v39  ;;  %v1898_v19 = vsub.f32 0.0, %v4395_v10  ;;  %v4399_v13 = vadd.f32 %v4229_v51, %v1808_v52  ;;  %v1349_v61 = vadd.f32 %v1348_v7, %v4138_v60  ;;  %v3005_v58 = vpop.f32.mrb[93].mxu1 }
 0x229   : > { %v3258_v27 = vpop.eup %3257  ;;  %v2143_v15 = vmul.f32 %v3256_v26, %v4350_v37  ;;  %v1351_v57 = vpop.f32.mrb[94].mxu1 }
 0x22a   : > { %v3260_v24 = vpop.eup %3259  ;;  %v2062_v3 = vadd.f32 1.0, %v3258_v27  ;;  %v1940_v29 = vmin.f32 %v1898_v19, 80.0  ;;  %v1899_v16 = vsub.f32 0.0, %v4399_v13  ;;  %v1352_v62 = vadd.f32 %v1351_v57, %v4143_v12  ;;  %v3006_v1 = vpop.f32.mrb[95].mxu1 }
 0x22b   : > { %v2715_v30 = vpack.c.bf16 %v2143_v15, %v2142_v25  ;;  %v2063_v5 = vadd.f32 1.0, %v3260_v24  ;;  %v1720_v2 = vpop.f32.mrb[96].mxu0 }
 0x22c   : > { %3269 = vrcp.f32 %v2062_v3  ;;  %v2006_v60 = vmul.f32 1.442695, %v1940_v29  ;;  %v1941_v31 = vmin.f32 %v1899_v16, 80.0  ;;  %v1809_v59 = vadd.f32 %v1720_v2, %v1349_v61  ;;  %v3091_v42 = vpop.f32.mrb[97].mxu0 }
 0x22d   : > { %v3262_v32 = vpop.eup %3261  ;;  %2784 = vst [vmem:[%s4295_s9 + $0x40] sm:$0xff] %v2715_v30   ;;  %3271 = vrcp.f32 %v2063_v5  ;;  %v1723_v37 = vpop.f32.mrb[98].mxu0 }
 0x22e   : > { %3273 = vpow2.f32 %v2006_v60  ;;  %v2008_v34 = vmul.f32 1.442695, %v1941_v31  ;;  %v4408_v45 = vadd.f32 %v4229_v51, %v1809_v59  ;;  %v3092_v55 = vpop.f32.mrb[99].mxu0  ;;  %v2144_v22 = vmul.f32 %v3262_v32, %v4356_v36 }
 0x22f   : > { %v3264_v12 = vpop.eup %3263  ;;  %v1810_v63 = vadd.f32 %v1723_v37, %v1352_v62  ;;  %v1356_v33 = vpop.f32.mrb[96].mxu1 }
 0x230   : > { %v2145_v53 = vmul.f32 %v3264_v12, %v4362_v54  ;;  %3275 = vpow2.f32 %v2008_v34  ;;  %v1900_v48 = vsub.f32 0.0, %v4408_v45  ;;  %v1357_v38 = vadd.f32 %v1356_v33, %v4159_v56  ;;  %v3009_v11 = vpop.f32.mrb[97].mxu1 }
 0x231   : > { %v3266_v28 = vpop.eup %3265  ;;  %v4415_v35 = vadd.f32 %v4229_v51, %v1810_v63  ;;  %v1359_v20 = vpop.f32.mrb[98].mxu1 }
 0x232   : > { %v3268_v39 = vpop.eup %3267  ;;  %v2720_v52 = vpack.c.bf16 %v2145_v53, %v2144_v22  ;;  %v2064_v8 = vadd.f32 1.0, %v3266_v28  ;;  %v1942_v36 = vmin.f32 %v1900_v48, 80.0  ;;  %v1360_v7 = vadd.f32 %v1359_v20, %v4164_v18  ;;  %v3010_v26 = vpop.f32.mrb[99].mxu1 }
 0x233   : > { %v2065_v54 = vadd.f32 1.0, %v3268_v39  ;;  %v1901_v19 = vsub.f32 0.0, %v4415_v35  ;;  %v1728_v61 = vpop.f32.mrb[100].mxu0 }
 0x234   : > { %2785 = vst [vmem:[%s4295_s9 + $0x48] sm:$0xff] %v2720_v52   ;;  %3277 = vrcp.f32 %v2064_v8  ;;  %v2010_v56 = vmul.f32 1.442695, %v1942_v36  ;;  %v1811_v58 = vadd.f32 %v1728_v61, %v1357_v38  ;;  %v3095_v27 = vpop.f32.mrb[101].mxu0 }
 0x235   : > { %3279 = vrcp.f32 %v2065_v54  ;;  %v1943_v25 = vmin.f32 %v1901_v19, 80.0  ;;  %v1731_v15 = vpop.f32.mrb[102].mxu0 }
 0x236   : > { %v3270_v57 = vpop.eup %3269  ;;  %3281 = vpow2.f32 %v2010_v56  ;;  %v4421_v24 = vadd.f32 %v4229_v51, %v1811_v58  ;;  %v1812_v3 = vadd.f32 %v1731_v15, %v1360_v7  ;;  %v3096_v18 = vpop.f32.mrb[103].mxu0 }
 0x237   : > { %v3272_v29 = vpop.eup %3271  ;;  %v2146_v16 = vmul.f32 %v3270_v57, %v4369_v46  ;;  %v2012_v62 = vmul.f32 1.442695, %v1943_v25  ;;  %v1364_v1 = vpop.f32.mrb[100].mxu1 }
 0x238   : > { %v3274_v30 = vpop.eup %3273  ;;  %v2147_v5 = vmul.f32 %v3272_v29, %v4373_v40  ;;  %v1902_v2 = vsub.f32 0.0, %v4421_v24  ;;  %v4427_v60 = vadd.f32 %v4229_v51, %v1812_v3  ;;  %v1365_v31 = vadd.f32 %v1364_v1, %v4174_v6  ;;  %v3013_v59 = vpop.f32.mrb[101].mxu1 }
 0x239   : > { %v2066_v42 = vadd.f32 1.0, %v3274_v30  ;;  %3283 = vpow2.f32 %v2012_v62  ;;  %v1367_v32 = vpop.f32.mrb[102].mxu1 }
 0x23a   : > { %v3276_v37 = vpop.eup %3275  ;;  %v2725_v34 = vpack.c.bf16 %v2147_v5, %v2146_v16  ;;  %v1944_v46 = vmin.f32 %v1902_v2, 80.0  ;;  %v1903_v55 = vsub.f32 0.0, %v4427_v60  ;;  %v1368_v12 = vadd.f32 %v1367_v32, %v4178_v23  ;;  %v3014_v40 = vpop.f32.mrb[103].mxu1  ;;  %v4449_v2 = vld [vmem:[%s4529_s2] ss:$0 sm:$0xff] }
 0x23b   : > { %3285 = vrcp.f32 %v2066_v42  ;;  %v2067_v22 = vadd.f32 1.0, %v3276_v37  ;;  %v1736_v63 = vpop.f32.mrb[104].mxu0 }
 0x23c   : > { %2786 = vst [vmem:[%s4295_s9 + $0x50] sm:$0xff] %v2725_v34   ;;  %v2014_v33 = vmul.f32 1.442695, %v1944_v46  ;;  %v1945_v53 = vmin.f32 %v1903_v55, 80.0  ;;  %v1813_v48 = vadd.f32 %v1736_v63, %v1365_v31  ;;  %v3099_v6 = vpop.f32.mrb[105].mxu0 }
 0x23d   : > { %3287 = vrcp.f32 %v2067_v22  ;;  %v1739_v38 = vpop.f32.mrb[106].mxu0 }
 0x23e   : > { %v3278_v11 = vpop.eup %3277  ;;  %3289 = vpow2.f32 %v2014_v33  ;;  %v2016_v28 = vmul.f32 1.442695, %v1945_v53  ;;  %v4434_v20 = vadd.f32 %v4229_v51, %v1813_v48  ;;  %v1814_v39 = vadd.f32 %v1739_v38, %v1368_v12  ;;  %v3100_v52 = vpop.f32.mrb[107].mxu0 }
 0x23f   : > { %v3280_v23 = vpop.eup %3279  ;;  %v2148_v8 = vmul.f32 %v3278_v11, %v4383_v17  ;;  %v1372_v36 = vpop.f32.mrb[104].mxu1 }
 0x240   : > { %v3282_v7 = vpop.eup %3281  ;;  %v2149_v26 = vmul.f32 %v3280_v23, %v4387_v43  ;;  %3291 = vpow2.f32 %v2016_v28  ;;  %v1904_v54 = vsub.f32 0.0, %v4434_v20  ;;  %v4440_v19 = vadd.f32 %v4229_v51, %v1814_v39  ;;  %v3017_v61 = vpop.f32.mrb[105].mxu1 }
 0x241   : > { %v2068_v56 = vadd.f32 1.0, %v3282_v7  ;;  %v1373_v58 = vadd.f32 %v1372_v36, %v4184_v49  ;;  %v1375_v27 = vpop.f32.mrb[106].mxu1 }
 0x242   : > { %v2730_v25 = vpack.c.bf16 %v2149_v26, %v2148_v8  ;;  %v1946_v15 = vmin.f32 %v1904_v54, 80.0  ;;  %v1905_v17 = vsub.f32 0.0, %v4440_v19  ;;  %v1376_v57 = vadd.f32 %v1375_v27, %v4186_v41  ;;  %v3018_v3 = vpop.f32.mrb[107].mxu1 }
 0x243   : > { %v3284_v43 = vpop.eup %3283  ;;  %3293 = vrcp.f32 %v2068_v56  ;;  %v1744_v18 = vpop.f32.mrb[108].mxu0 }
 0x244   : > { %2787 = vst [vmem:[%s4295_s9 + $0x58] sm:$0xff] %v2730_v25   ;;  %v2069_v29 = vadd.f32 1.0, %v3284_v43  ;;  %v2018_v16 = vmul.f32 1.442695, %v1946_v15  ;;  %v1947_v51 = vmin.f32 %v1905_v17, 80.0  ;;  %v1815_v62 = vadd.f32 %v1744_v18, %v1373_v58  ;;  %v3103_v1 = vpop.f32.mrb[109].mxu0 }
 0x245   : > { %v3286_v30 = vpop.eup %3285  ;;  %v1747_v5 = vpop.f32.mrb[110].mxu0 }
 0x246   : > { %3295 = vrcp.f32 %v2069_v29  ;;  %v2020_v49 = vmul.f32 1.442695, %v1947_v51  ;;  %v4452_v41 = vadd.f32 %v4449_v2, %v1815_v62  ;;  %v3104_v31 = vpop.f32.mrb[111].mxu0  ;;  %v2150_v42 = vmul.f32 %v3286_v30, %v4395_v10 }
 0x247   : > { %v3288_v59 = vpop.eup %3287  ;;  %3297 = vpow2.f32 %v2018_v16  ;;  %v1816_v32 = vadd.f32 %v1747_v5, %v1376_v57  ;;  %v1380_v37 = vpop.f32.mrb[108].mxu1 }
 0x248   : > { %v3290_v34 = vpop.eup %3289  ;;  %v2151_v46 = vmul.f32 %v3288_v59, %v4399_v13  ;;  %3299 = vpow2.f32 %v2020_v49  ;;  %v1906_v55 = vsub.f32 0.0, %v4452_v41  ;;  %v1381_v12 = vadd.f32 %v1380_v37, %v4192_v47  ;;  %v3021_v40 = vpop.f32.mrb[109].mxu1 }
 0x249   : > { %v2070_v22 = vadd.f32 1.0, %v3290_v34  ;;  %v4459_v63 = vadd.f32 %v4449_v2, %v1816_v32  ;;  %v1383_v33 = vpop.f32.mrb[110].mxu1 }
 0x24a   : > { %v3292_v53 = vpop.eup %3291  ;;  %v2735_v10 = vpack.c.bf16 %v2151_v46, %v2150_v42  ;;  %v1948_v48 = vmin.f32 %v1906_v55, 80.0  ;;  %v1384_v6 = vadd.f32 %v1383_v33, %v4194_v44  ;;  %v3022_v38 = vpop.f32.mrb[111].mxu1 }
 0x24b   : > { %3301 = vrcp.f32 %v2070_v22  ;;  %v2071_v13 = vadd.f32 1.0, %v3292_v53  ;;  %v1907_v11 = vsub.f32 0.0, %v4459_v63  ;;  %v1752_v28 = vpop.f32.mrb[112].mxu0 }
 0x24c   : > { %2788 = vst [vmem:[%s4295_s9 + $0x60] sm:$0xff] %v2735_v10   ;;  %v2022_v39 = vmul.f32 1.442695, %v1948_v48  ;;  %v1817_v47 = vadd.f32 %v1752_v28, %v1381_v12  ;;  %v3107_v52 = vpop.f32.mrb[113].mxu0 }
 0x24d   : > { %v3294_v23 = vpop.eup %3293  ;;  %3303 = vrcp.f32 %v2071_v13  ;;  %v1949_v8 = vmin.f32 %v1907_v11, 80.0  ;;  %v1755_v36 = vpop.f32.mrb[114].mxu0 }
 0x24e   : > { %3305 = vpow2.f32 %v2022_v39  ;;  %v4465_v7 = vadd.f32 %v4449_v2, %v1817_v47  ;;  %v1818_v26 = vadd.f32 %v1755_v36, %v1384_v6  ;;  %v3108_v44 = vpop.f32.mrb[115].mxu0  ;;  %v2152_v57 = vmul.f32 %v3294_v23, %v4408_v45 }
 0x24f   : > { %v2024_v54 = vmul.f32 1.442695, %v1949_v8  ;;  %v1388_v61 = vpop.f32.mrb[112].mxu1 }
 0x250   : > { %v3296_v56 = vpop.eup %3295  ;;  %v1908_v58 = vsub.f32 0.0, %v4465_v7  ;;  %v4469_v27 = vadd.f32 %v4449_v2, %v1818_v26  ;;  %v1389_v25 = vadd.f32 %v1388_v61, %v4200_v4  ;;  %v3025_v15 = vpop.f32.mrb[113].mxu1 }
 0x251   : > { %v3298_v17 = vpop.eup %3297  ;;  %v2153_v3 = vmul.f32 %v3296_v56, %v4415_v35  ;;  %3307 = vpow2.f32 %v2024_v54  ;;  %v1391_v43 = vpop.f32.mrb[114].mxu1 }
 0x252   : > { %v3300_v18 = vpop.eup %3299  ;;  %v2072_v29 = vadd.f32 1.0, %v3298_v17  ;;  %v1950_v16 = vmin.f32 %v1908_v58, 80.0  ;;  %v1909_v51 = vsub.f32 0.0, %v4469_v27  ;;  %v1392_v62 = vadd.f32 %v1391_v43, %v4202_v14  ;;  %v3026_v1 = vpop.f32.mrb[115].mxu1 }
 0x253   : > { %v2740_v30 = vpack.c.bf16 %v2153_v3, %v2152_v57  ;;  %v2073_v5 = vadd.f32 1.0, %v3300_v18  ;;  %v1760_v4 = vpop.f32.mrb[116].mxu0 }
 0x254   : > { %3309 = vrcp.f32 %v2072_v29  ;;  %v2026_v49 = vmul.f32 1.442695, %v1950_v16  ;;  %v1951_v31 = vmin.f32 %v1909_v51, 80.0  ;;  %v1819_v45 = vadd.f32 %v1760_v4, %v1389_v25  ;;  %v3111_v59 = vpop.f32.mrb[117].mxu0 }
 0x255   : > { %v3302_v35 = vpop.eup %3301  ;;  %2789 = vst [vmem:[%s4295_s9 + $0x68] sm:$0xff] %v2740_v30   ;;  %3311 = vrcp.f32 %v2073_v5  ;;  %v1763_v42 = vpop.f32.mrb[118].mxu0 }
 0x256   : > { %3313 = vpow2.f32 %v2026_v49  ;;  %v2028_v32 = vmul.f32 1.442695, %v1951_v31  ;;  %v4478_v37 = vadd.f32 %v4449_v2, %v1819_v45  ;;  %v3112_v34 = vpop.f32.mrb[119].mxu0  ;;  %v2154_v46 = vmul.f32 %v3302_v35, %v4421_v24 }
 0x257   : > { %v3304_v14 = vpop.eup %3303  ;;  %v1820_v55 = vadd.f32 %v1763_v42, %v1392_v62  ;;  %v1396_v12 = vpop.f32.mrb[116].mxu1 }
 0x258   : > { %v3306_v40 = vpop.eup %3305  ;;  %v2155_v22 = vmul.f32 %v3304_v14, %v4427_v60  ;;  %3315 = vpow2.f32 %v2028_v32  ;;  %v1910_v33 = vsub.f32 0.0, %v4478_v37  ;;  %v1397_v53 = vadd.f32 %v1396_v12, %v4208_v50  ;;  %v3029_v10 = vpop.f32.mrb[117].mxu1 }
 0x259   : > { %v2074_v48 = vadd.f32 1.0, %v3306_v40  ;;  %v4485_v6 = vadd.f32 %v4449_v2, %v1820_v55  ;;  %v1399_v38 = vpop.f32.mrb[118].mxu1 }
 0x25a   : > { %v2745_v13 = vpack.c.bf16 %v2155_v22, %v2154_v46  ;;  %v1952_v11 = vmin.f32 %v1910_v33, 80.0  ;;  %v1400_v24 = vadd.f32 %v1399_v38, %v4210_v0  ;;  %v3030_v28 = vpop.f32.mrb[119].mxu1 }
 0x25b   : > { %v3308_v39 = vpop.eup %3307  ;;  %v1911_v47 = vsub.f32 0.0, %v4485_v6  ;;  %v1768_v60 = vpop.f32.mrb[120].mxu0  ;;  %3317 = vrcp.f32 %v2074_v48 }
 0x25c   : > { %2790 = vst [vmem:[%s4295_s9 + $0x70] sm:$0xff] %v2745_v13   ;;  %v2075_v52 = vadd.f32 1.0, %v3308_v39  ;;  %v2030_v23 = vmul.f32 1.442695, %v1952_v11  ;;  %v1821_v50 = vadd.f32 %v1768_v60, %v1397_v53  ;;  %v3115_v8 = vpop.f32.mrb[121].mxu0 }
 0x25d   : > { %v1953_v36 = vmin.f32 %v1911_v47, 80.0  ;;  %v1771_v26 = vpop.f32.mrb[122].mxu0 }
 0x25e   : > { %v3310_v44 = vpop.eup %3309  ;;  %3319 = vrcp.f32 %v2075_v52  ;;  %v4491_v54 = vadd.f32 %v4449_v2, %v1821_v50  ;;  %v1822_v61 = vadd.f32 %v1771_v26, %v1400_v24  ;;  %v3116_v0 = vpop.f32.mrb[123].mxu0 }
 0x25f   : > { %v3312_v56 = vpop.eup %3311  ;;  %v2156_v58 = vmul.f32 %v3310_v44, %v4434_v20  ;;  %3321 = vpow2.f32 %v2030_v23  ;;  %v2032_v25 = vmul.f32 1.442695, %v1953_v36  ;;  %v1404_v15 = vpop.f32.mrb[120].mxu1 }
 0x260   : > { %v3314_v17 = vpop.eup %3313  ;;  %v2157_v57 = vmul.f32 %v3312_v56, %v4440_v19  ;;  %v1912_v3 = vsub.f32 0.0, %v4491_v54  ;;  %v4497_v43 = vadd.f32 %v4449_v2, %v1822_v61  ;;  %v1405_v18 = vadd.f32 %v1404_v15, %v4216_v9  ;;  %v3033_v29 = vpop.f32.mrb[121].mxu1 }
 0x261   : > { %v2076_v16 = vadd.f32 1.0, %v3314_v17  ;;  %3323 = vpow2.f32 %v2032_v25  ;;  %v1407_v51 = vpop.f32.mrb[122].mxu1 }
 0x262   : > { %v3316_v62 = vpop.eup %3315  ;;  %v2750_v20 = vpack.c.bf16 %v2157_v57, %v2156_v58  ;;  %v1954_v1 = vmin.f32 %v1912_v3, 80.0  ;;  %v1913_v30 = vsub.f32 0.0, %v4497_v43  ;;  %v1408_v5 = vadd.f32 %v1407_v51, %v4218_v21  ;;  %v3034_v19 = vpop.f32.mrb[123].mxu1 }
 0x263   : > { %3325 = vrcp.f32 %v2076_v16  ;;  %v2077_v4 = vadd.f32 1.0, %v3316_v62  ;;  %v1776_v49 = vpop.f32.mrb[124].mxu0 }
 0x264   : > { %2791 = vst [vmem:[%s4295_s9 + $0x78] sm:$0xff] %v2750_v20   ;;  %v2034_v31 = vmul.f32 1.442695, %v1954_v1  ;;  %v1955_v45 = vmin.f32 %v1913_v30, 80.0  ;;  %v1823_v59 = vadd.f32 %v1776_v49, %v1405_v18  ;;  %v3119_v9 = vpop.f32.mrb[125].mxu0 }
 0x265   : > { %3327 = vrcp.f32 %v2077_v4  ;;  %v1779_v35 = vpop.f32.mrb[126].mxu0  ;;  %v3318_v42 = vpop.eup %3317 }
 0x266   : > { %3329 = vpow2.f32 %v2034_v31  ;;  %v2036_v32 = vmul.f32 1.442695, %v1955_v45  ;;  %v1872_v34 = vadd.f32 %v4449_v2, %v1823_v59  ;;  %v3120_v14 = vpop.f32.mrb[127].mxu0  ;;  %v1824_v46 = vadd.f32 %v1779_v35, %v1408_v5 }
 0x267   : > { %v2158_v40 = vmul.f32 %v3318_v42, %v4452_v41 }
 0x268   : > { %v3320_v55 = vpop.eup %3319  ;;  %3331 = vpow2.f32 %v2036_v32  ;;  %v1914_v21 = vsub.f32 0.0, %v1872_v34  ;;  %v1873_v33 = vadd.f32 %v4449_v2, %v1824_v46 }
 0x269   : > { %v3322_v12 = vpop.eup %3321  ;;  %v2159_v22 = vmul.f32 %v3320_v55, %v4459_v63 }
 0x26a   : > { %v2078_v53 = vadd.f32 1.0, %v3322_v12  ;;  %v1956_v10 = vmin.f32 %v1914_v21, 80.0  ;;  %v1915_v13 = vsub.f32 0.0, %v1873_v33 }
 0x26b   : > { %v3324_v48 = vpop.eup %3323  ;;  %v2755_v38 = vpack.c.bf16 %v2159_v22, %v2158_v40 }
 0x26c   : > { %3333 = vrcp.f32 %v2078_v53  ;;  %v2079_v11 = vadd.f32 1.0, %v3324_v48  ;;  %v2038_v24 = vmul.f32 1.442695, %v1956_v10  ;;  %v1957_v39 = vmin.f32 %v1915_v13, 80.0 }
 0x26d   : > { %v3326_v28 = vpop.eup %3325  ;;  %2792 = vst [vmem:[%s4295_s9 + $0x80] sm:$0xff] %v2755_v38  }
 0x26e   : > { %3335 = vrcp.f32 %v2079_v11  ;;  %v2040_v41 = vmul.f32 1.442695, %v1957_v39  ;;  %v2160_v63 = vmul.f32 %v3326_v28, %v4465_v7 }
 0x26f   : > { %v3328_v47 = vpop.eup %3327  ;;  %3337 = vpow2.f32 %v2038_v24 }
 0x270   : > { %v3330_v60 = vpop.eup %3329  ;;  %v2161_v2 = vmul.f32 %v3328_v47, %v4469_v27  ;;  %3339 = vpow2.f32 %v2040_v41 }
 0x271   : > { %v2080_v52 = vadd.f32 1.0, %v3330_v60 }
 0x272   : > { %v3332_v23 = vpop.eup %3331  ;;  %v2760_v50 = vpack.c.bf16 %v2161_v2, %v2160_v63 }
 0x273   : > { %3341 = vrcp.f32 %v2080_v52  ;;  %v2081_v8 = vadd.f32 1.0, %v3332_v23 }
 0x274   : > { %2793 = vst [vmem:[%s4295_s9 + $0x88] sm:$0xff] %v2760_v50  }
 0x275   : > { %3343 = vrcp.f32 %v2081_v8 }
 0x276   : > { %v3334_v36 = vpop.eup %3333 }
 0x277   : > { %v2162_v61 = vmul.f32 %v3334_v36, %v4478_v37 }
 0x278   : > { %v3336_v26 = vpop.eup %3335 }
 0x279   : > { %v3338_v44 = vpop.eup %3337  ;;  %v2163_v0 = vmul.f32 %v3336_v26, %v4485_v6 }
 0x27a   : > { %v2082_v7 = vadd.f32 1.0, %v3338_v44  ;;  %v3340_v56 = vpop.eup %3339 }
 0x27b   : > { %v2765_v27 = vpack.c.bf16 %v2163_v0, %v2162_v61  ;;  %v2083_v58 = vadd.f32 1.0, %v3340_v56 }
 0x27c   : > { %3345 = vrcp.f32 %v2082_v7 }
 0x27d   : > { %v3342_v25 = vpop.eup %3341  ;;  %2794 = vst [vmem:[%s4295_s9 + $0x90] sm:$0xff] %v2765_v27   ;;  %3347 = vrcp.f32 %v2083_v58 }
 0x27e   : > { %v2164_v17 = vmul.f32 %v3342_v25, %v4491_v54 }
 0x27f   : > { %v3344_v15 = vpop.eup %3343 }
 0x280   : > { %v2165_v57 = vmul.f32 %v3344_v15, %v4497_v43 }
 0x282   : > { %v2770_v3 = vpack.c.bf16 %v2165_v57, %v2164_v17 }
 0x284   : > { %2795 = vst [vmem:[%s4295_s9 + $0x98] sm:$0xff] %v2770_v3  }
 0x286   : > { %v3346_v18 = vpop.eup %3345 }
 0x287   : > { %v3348_v37 = vpop.eup %3347  ;;  %v2166_v29 = vmul.f32 %v3346_v18, %v1872_v34 }
 0x288   : > { %v2167_v6 = vmul.f32 %v3348_v37, %v1873_v33 }
 0x28a   : > { %v2775_v16 = vpack.c.bf16 %v2167_v6, %v2166_v29 }
 0x28c   : > { %2796 = vst [vmem:[%s4295_s9 + $0xa0] sm:$0xff] %v2775_v16  }
 0x28d PF: > { %s13_s14 = sadd.s32 1, %s3372_s14   ;;  %s4532_s12 = smov %s3368_s13 }
 0x28e   : > { %p10_p6 = scmp.ge.s32.totalorder %s13_s14, 4   ;;  %s4533_s13 = smov %s4535_s15 }
 0x290   :  { %12 = sbr.rel (!%p10_p6) target bundleno = 2 (0x2), region = 70 }

</bundles_post_ra>
